<compile_context>
chip_gen: v6e
topology: v6e:2x2x1
jax: 0.10.0
libtpu: 0.0.40
codegen_flags: <defaults>
</compile_context>

<pallas_src>
import jax
import jax.numpy as jnp
from jax.experimental import pallas as pl
from jax.experimental.pallas import tpu as pltpu

IN_F = 28 * 28      # 784 contraction dim (NOT padded; 784 % 16 == 0)
HID = 512
N_OUT = 10
N_PAD = 128         # 10 padded to a full lane width (unmasked vst on the output)


def _soft(z, tau):
    # soft(x, tau) = relu(x - tau) - relu(-x - tau).
    # For tau >= 0 (module regime: tau inits at 0.0 and acts as a soft threshold)
    # this equals z - clip(z, -tau, tau)  -> 3 VPU ops instead of 5.
    return z - jnp.clip(z, -tau, tau)


def mlp_kernel(tau_ref,                      # SMEM (3,) f32 : tau1, tau2, tau3
               x_ref,                        # VMEM (TM, 784) f32 (cast to bf16 in-kernel)
               w1_ref, b1_ref,               # (784, 512) bf16, (1, 512) f32
               w2_ref, b2_ref,               # (512, 512) bf16, (1, 512) f32
               w3_ref, b3_ref,               # (512, 512) bf16, (1, 512) f32
               w4_ref, b4_ref,               # (512, 128) bf16, (1, 128) f32 (pad cols = -1e30)
               out_ref):                     # (TM, 128) f32 log-probs (cols >= 10 are padding)
    # Hoist scalar tau reads once per tile.
    tau1 = tau_ref[0]
    tau2 = tau_ref[1]
    tau3 = tau_ref[2]

    x = x_ref[...].astype(jnp.bfloat16)       # in-kernel cast (no separate XLA pad/cast pass)
    h = jnp.dot(x, w1_ref[...], preferred_element_type=jnp.float32) + b1_ref[...]
    h = _soft(h, tau1).astype(jnp.bfloat16)
    h = jnp.dot(h, w2_ref[...], preferred_element_type=jnp.float32) + b2_ref[...]
    h = _soft(h, tau2).astype(jnp.bfloat16)
    h = jnp.dot(h, w3_ref[...], preferred_element_type=jnp.float32) + b3_ref[...]
    h = _soft(h, tau3).astype(jnp.bfloat16)
    logits = jnp.dot(h, w4_ref[...], preferred_element_type=jnp.float32) + b4_ref[...]

    # log_softmax along dim=1. Padded columns carry bias -1e30 (f32), so exp()
    # underflows to 0 and they contribute nothing to the normalizer or the max.
    m = jnp.max(logits, axis=-1, keepdims=True)
    s = logits - m
    lse = jnp.log(jnp.sum(jnp.exp(s), axis=-1, keepdims=True))
    out_ref[...] = s - lse


def prepare_params(params):
    """One-time prep: (out,in) -> (in,out) transpose, bf16 cast, last-layer N padding."""
    w1 = params["w1"].T.astype(jnp.bfloat16)                       # (784, 512)
    w2 = params["w2"].T.astype(jnp.bfloat16)                       # (512, 512)
    w3 = params["w3"].T.astype(jnp.bfloat16)                       # (512, 512)
    w4 = jnp.pad(params["w4"].T, ((0, 0), (0, N_PAD - N_OUT))).astype(jnp.bfloat16)
    b1 = params["b1"].astype(jnp.float32).reshape(1, HID)
    b2 = params["b2"].astype(jnp.float32).reshape(1, HID)
    b3 = params["b3"].astype(jnp.float32).reshape(1, HID)
    # Keep b4 (and logits) in f32 so the -1e30 pad-column mask stays numerically sound.
    b4 = jnp.pad(params["b4"].astype(jnp.float32), (0, N_PAD - N_OUT),
                 constant_values=-1e30).reshape(1, N_PAD)
    taus = params["taus"].astype(jnp.float32)
    return dict(w1=w1, b1=b1, w2=w2, b2=b2, w3=w3, b3=b3, w4=w4, b4=b4, taus=taus)


def _pick_tm(batch):
    """Batch tile: whole batch when small; otherwise 256-row-aligned tiles capped at
    1024, chosen so the grid has >= 2 steps (both v7x TensorCores get work)."""
    if batch <= 256:
        return batch
    half = -(-batch // 2)               # cdiv(batch, 2)
    tm = -(-half // 256) * 256          # round up to a multiple of 256
    return min(tm, 1024)


@jax.jit
def neural_network_forward(x_nchw, prep):
    """x_nchw: (B, 1, 28, 28) f32. prep: output of prepare_params()."""
    B = x_nchw.shape[0]
    x2d = x_nchw.reshape(B, -1)         # == x.view(B, -1); stays f32, no pad, no copy

    TM = _pick_tm(B)
    grid = (pl.cdiv(B, TM),)

    const = lambda i: (0, 0)            # weights/biases: same block every tile -> VMEM-resident
    out_padded = pl.pallas_call(
        mlp_kernel,
        out_shape=jax.ShapeDtypeStruct((B, N_PAD), jnp.float32),
        grid=grid,
        in_specs=[
            pl.BlockSpec(memory_space=pltpu.MemorySpace.SMEM),     # taus (whole, SMEM)
            pl.BlockSpec((TM, IN_F), lambda i: (i, 0)),            # x batch tile (f32)
            pl.BlockSpec((IN_F, HID), const), pl.BlockSpec((1, HID), const),
            pl.BlockSpec((HID, HID), const),  pl.BlockSpec((1, HID), const),
            pl.BlockSpec((HID, HID), const),  pl.BlockSpec((1, HID), const),
            pl.BlockSpec((HID, N_PAD), const), pl.BlockSpec((1, N_PAD), const),
        ],
        out_specs=pl.BlockSpec((TM, N_PAD), lambda i: (i, 0)),
        compiler_params=pltpu.CompilerParams(
            dimension_semantics=("parallel",),
            vmem_limit_bytes=48 * 1024 * 1024,   # headroom for TM up to 1024 (v5e default is 16 MiB)
        ),
    )(prep["taus"], x2d, prep["w1"], prep["b1"], prep["w2"], prep["b2"],
      prep["w3"], prep["b3"], prep["w4"], prep["b4"])

    return out_padded[:, :N_OUT]


def _soft_exact(z, tau):
    # Exact torch form (valid for any tau sign) — used only by the reference.
    return jnp.maximum(z - tau, 0.0) - jnp.maximum(-z - tau, 0.0)


def _reference_forward(x_nchw, params, weight_dtype=jnp.float32):
    """Pure-JAX reference mirroring the PyTorch module (optionally at bf16 matmul precision)."""
    B = x_nchw.shape[0]
    h = x_nchw.reshape(B, -1)

    def lin(h, w, b):
        return jnp.dot(h.astype(weight_dtype), w.astype(weight_dtype).T,
                       preferred_element_type=jnp.float32) + b

    h = _soft_exact(lin(h, params["w1"], params["b1"]), params["taus"][0])
    h = _soft_exact(lin(h, params["w2"], params["b2"]), params["taus"][1])
    h = _soft_exact(lin(h, params["w3"], params["b3"]), params["taus"][2])
    logits = lin(h, params["w4"], params["b4"])
    return jax.nn.log_softmax(logits, axis=1)


def _init_params(key):
    """Deterministic synthetic init (PyTorch Linear shapes: weight (out, in))."""
    ks = jax.random.split(key, 8)

    def lin(kw, kb, out_f, in_f):
        scale = 1.0 / jnp.sqrt(in_f)
        w = jax.random.uniform(kw, (out_f, in_f), jnp.float32, -scale, scale)
        b = jax.random.uniform(kb, (out_f,), jnp.float32, -scale, scale)
        return w, b

    w1, b1 = lin(ks[0], ks[1], 512, 784)
    w2, b2 = lin(ks[2], ks[3], 512, 512)
    w3, b3 = lin(ks[4], ks[5], 512, 512)
    w4, b4 = lin(ks[6], ks[7], 10, 512)
    # Module default initializes tau = 0.0 (identity soft); use small non-negative
    # values here so the SoftAct nonlinearity is actually exercised.
    taus = jnp.array([0.1, 0.2, 0.3], dtype=jnp.float32)
    return dict(w1=w1, b1=b1, w2=w2, b2=b2, w3=w3, b3=b3, w4=w4, b4=b4, taus=taus)


def _check(x, params, prep, atol_bf16=5e-3, atol_f32=3e-2):
    out = jax.block_until_ready(neural_network_forward(x, prep))
    assert out.shape == (x.shape[0], N_OUT)
    ref_bf16 = _reference_forward(x, params, jnp.bfloat16)   # same matmul precision
    assert jnp.allclose(out, ref_bf16, atol=atol_bf16, rtol=atol_bf16), "mismatch vs bf16 reference"
    ref_f32 = _reference_forward(x, params, jnp.float32)     # exact module, f32
    assert jnp.allclose(out, ref_f32, atol=atol_f32, rtol=atol_f32), "mismatch vs f32 reference"
    return out


if __name__ == "__main__":
    key = jax.random.PRNGKey(0)
    k_params, k_x, k_x2 = jax.random.split(key, 3)
    params = _init_params(k_params)
    prep = prepare_params(params)                       # one-time, outside the forward path

    # Small MNIST-like batch (single-tile path, grid=(1,)).
    x = jax.random.normal(k_x, (8, 1, 28, 28), dtype=jnp.float32)
    _check(x, params, prep)

    # Ragged multi-tile path (B=300 -> TM=256, grid=(2,), partial last tile),
    # locking in the non-multiple-batch correctness concern from the review.
    x_big = jax.random.normal(k_x2, (300, 1, 28, 28), dtype=jnp.float32)
    _check(x_big, params, prep)

    print("KERNEL_OK")
</pallas_src>

<mosaic_0001>
module attributes {stable_mosaic.version = 11 : i64} {
  func.func @mlp_kernel(%arg0: i32, %arg1: memref<3xf32, #tpu.memory_space<smem>>, %arg2: memref<8x784xf32, #tpu.memory_space<vmem>>, %arg3: memref<784x512xbf16, #tpu.memory_space<vmem>>, %arg4: memref<1x512xf32, #tpu.memory_space<vmem>>, %arg5: memref<512x512xbf16, #tpu.memory_space<vmem>>, %arg6: memref<1x512xf32, #tpu.memory_space<vmem>>, %arg7: memref<512x512xbf16, #tpu.memory_space<vmem>>, %arg8: memref<1x512xf32, #tpu.memory_space<vmem>>, %arg9: memref<512x128xbf16, #tpu.memory_space<vmem>>, %arg10: memref<1x128xf32, #tpu.memory_space<vmem>>, %arg11: memref<8x128xf32, #tpu.memory_space<vmem>>) attributes {dimension_semantics = [#tpu.dimension_semantics<parallel>], iteration_bounds = array<i64: 1>, scalar_prefetch = 0 : i64, scratch_operands = 0 : i64, tpu.core_type = #tpu.core_type<tc>, window_params = [{transform_indices = @transform_0, window_bounds = array<i64: 3>}, {transform_indices = @transform_1, window_bounds = array<i64: 8, 784>}, {pipeline_mode = #tpu.pipeline_mode<synchronous>, transform_indices = @transform_2, window_bounds = array<i64: 784, 512>}, {pipeline_mode = #tpu.pipeline_mode<synchronous>, transform_indices = @transform_3, window_bounds = array<i64: 1, 512>}, {pipeline_mode = #tpu.pipeline_mode<synchronous>, transform_indices = @transform_4, window_bounds = array<i64: 512, 512>}, {pipeline_mode = #tpu.pipeline_mode<synchronous>, transform_indices = @transform_5, window_bounds = array<i64: 1, 512>}, {pipeline_mode = #tpu.pipeline_mode<synchronous>, transform_indices = @transform_6, window_bounds = array<i64: 512, 512>}, {pipeline_mode = #tpu.pipeline_mode<synchronous>, transform_indices = @transform_7, window_bounds = array<i64: 1, 512>}, {pipeline_mode = #tpu.pipeline_mode<synchronous>, transform_indices = @transform_8, window_bounds = array<i64: 512, 128>}, {pipeline_mode = #tpu.pipeline_mode<synchronous>, transform_indices = @transform_9, window_bounds = array<i64: 1, 128>}, {transform_indices = @transform_10, window_bounds = array<i64: 8, 128>}]} {
    %c0 = arith.constant 0 : index
    %0 = memref.load %arg1[%c0] : memref<3xf32, #tpu.memory_space<smem>>
    %c1 = arith.constant 1 : index
    %1 = memref.load %arg1[%c1] : memref<3xf32, #tpu.memory_space<smem>>
    %c2 = arith.constant 2 : index
    %2 = memref.load %arg1[%c2] : memref<3xf32, #tpu.memory_space<smem>>
    %c0_0 = arith.constant 0 : index
    %c0_1 = arith.constant 0 : index
    %3 = vector.load %arg2[%c0_0, %c0_1] : memref<8x784xf32, #tpu.memory_space<vmem>>, vector<8x784xf32>
    %4 = arith.truncf %3 : vector<8x784xf32> to vector<8x784xbf16>
    %c0_2 = arith.constant 0 : index
    %c0_3 = arith.constant 0 : index
    %5 = vector.load %arg3[%c0_2, %c0_3] : memref<784x512xbf16, #tpu.memory_space<vmem>>, vector<784x512xbf16>
    %cst = arith.constant dense<0.000000e+00> : vector<8x512xf32>
    %6 = tpu.matmul %4, %5, %cst {dimension_numbers = #tpu.dot_dimension_numbers<[1], [0], [0], [1], [0, 0, 1, 1], [], []>} : vector<8x784xbf16>, vector<784x512xbf16>, vector<8x512xf32> -> vector<8x512xf32>
    %c0_4 = arith.constant 0 : index
    %c0_5 = arith.constant 0 : index
    %7 = vector.load %arg4[%c0_4, %c0_5] : memref<1x512xf32, #tpu.memory_space<vmem>>, vector<1x512xf32>
    %8 = vector.broadcast %7 : vector<1x512xf32> to vector<8x512xf32>
    %9 = arith.addf %6, %8 : vector<8x512xf32>
    %cst_6 = arith.constant 0.000000e+00 : f32
    %10 = arith.subf %cst_6, %0 : f32
    %11 = vector.broadcast %10 : f32 to vector<8x512xf32>
    %12 = arith.maximumf %11, %9 : vector<8x512xf32>
    %13 = vector.broadcast %0 : f32 to vector<8x512xf32>
    %14 = arith.minimumf %13, %12 : vector<8x512xf32>
    %15 = arith.subf %9, %14 : vector<8x512xf32>
    %16 = arith.truncf %15 : vector<8x512xf32> to vector<8x512xbf16>
    %c0_7 = arith.constant 0 : index
    %c0_8 = arith.constant 0 : index
    %17 = vector.load %arg5[%c0_7, %c0_8] : memref<512x512xbf16, #tpu.memory_space<vmem>>, vector<512x512xbf16>
    %cst_9 = arith.constant dense<0.000000e+00> : vector<8x512xf32>
    %18 = tpu.matmul %16, %17, %cst_9 {dimension_numbers = #tpu.dot_dimension_numbers<[1], [0], [0], [1], [0, 0, 1, 1], [], []>} : vector<8x512xbf16>, vector<512x512xbf16>, vector<8x512xf32> -> vector<8x512xf32>
    %c0_10 = arith.constant 0 : index
    %c0_11 = arith.constant 0 : index
    %19 = vector.load %arg6[%c0_10, %c0_11] : memref<1x512xf32, #tpu.memory_space<vmem>>, vector<1x512xf32>
    %20 = vector.broadcast %19 : vector<1x512xf32> to vector<8x512xf32>
    %21 = arith.addf %18, %20 : vector<8x512xf32>
    %cst_12 = arith.constant 0.000000e+00 : f32
    %22 = arith.subf %cst_12, %1 : f32
    %23 = vector.broadcast %22 : f32 to vector<8x512xf32>
    %24 = arith.maximumf %23, %21 : vector<8x512xf32>
    %25 = vector.broadcast %1 : f32 to vector<8x512xf32>
    %26 = arith.minimumf %25, %24 : vector<8x512xf32>
    %27 = arith.subf %21, %26 : vector<8x512xf32>
    %28 = arith.truncf %27 : vector<8x512xf32> to vector<8x512xbf16>
    %c0_13 = arith.constant 0 : index
    %c0_14 = arith.constant 0 : index
    %29 = vector.load %arg7[%c0_13, %c0_14] : memref<512x512xbf16, #tpu.memory_space<vmem>>, vector<512x512xbf16>
    %cst_15 = arith.constant dense<0.000000e+00> : vector<8x512xf32>
    %30 = tpu.matmul %28, %29, %cst_15 {dimension_numbers = #tpu.dot_dimension_numbers<[1], [0], [0], [1], [0, 0, 1, 1], [], []>} : vector<8x512xbf16>, vector<512x512xbf16>, vector<8x512xf32> -> vector<8x512xf32>
    %c0_16 = arith.constant 0 : index
    %c0_17 = arith.constant 0 : index
    %31 = vector.load %arg8[%c0_16, %c0_17] : memref<1x512xf32, #tpu.memory_space<vmem>>, vector<1x512xf32>
    %32 = vector.broadcast %31 : vector<1x512xf32> to vector<8x512xf32>
    %33 = arith.addf %30, %32 : vector<8x512xf32>
    %cst_18 = arith.constant 0.000000e+00 : f32
    %34 = arith.subf %cst_18, %2 : f32
    %35 = vector.broadcast %34 : f32 to vector<8x512xf32>
    %36 = arith.maximumf %35, %33 : vector<8x512xf32>
    %37 = vector.broadcast %2 : f32 to vector<8x512xf32>
    %38 = arith.minimumf %37, %36 : vector<8x512xf32>
    %39 = arith.subf %33, %38 : vector<8x512xf32>
    %40 = arith.truncf %39 : vector<8x512xf32> to vector<8x512xbf16>
    %c0_19 = arith.constant 0 : index
    %c0_20 = arith.constant 0 : index
    %41 = vector.load %arg9[%c0_19, %c0_20] : memref<512x128xbf16, #tpu.memory_space<vmem>>, vector<512x128xbf16>
    %cst_21 = arith.constant dense<0.000000e+00> : vector<8x128xf32>
    %42 = tpu.matmul %40, %41, %cst_21 {dimension_numbers = #tpu.dot_dimension_numbers<[1], [0], [0], [1], [0, 0, 1, 1], [], []>} : vector<8x512xbf16>, vector<512x128xbf16>, vector<8x128xf32> -> vector<8x128xf32>
    %c0_22 = arith.constant 0 : index
    %c0_23 = arith.constant 0 : index
    %43 = vector.load %arg10[%c0_22, %c0_23] : memref<1x128xf32, #tpu.memory_space<vmem>>, vector<1x128xf32>
    %44 = vector.broadcast %43 : vector<1x128xf32> to vector<8x128xf32>
    %45 = arith.addf %42, %44 : vector<8x128xf32>
    %cst_24 = arith.constant dense<0xFF800000> : vector<8xf32>
    %46 = vector.multi_reduction <maximumf>, %45, %cst_24 [1] : vector<8x128xf32> to vector<8xf32>
    %47 = vector.shape_cast %46 : vector<8xf32> to vector<8x1xf32>
    %48 = vector.broadcast %47 : vector<8x1xf32> to vector<8x128xf32>
    %49 = arith.subf %45, %48 : vector<8x128xf32>
    %50 = math.exp %49 : vector<8x128xf32>
    %cst_25 = arith.constant dense<0.000000e+00> : vector<8xf32>
    %51 = vector.multi_reduction <add>, %50, %cst_25 [1] : vector<8x128xf32> to vector<8xf32>
    %52 = vector.shape_cast %51 : vector<8xf32> to vector<8x1xf32>
    %53 = math.log %52 : vector<8x1xf32>
    %54 = vector.broadcast %53 : vector<8x1xf32> to vector<8x128xf32>
    %55 = arith.subf %49, %54 : vector<8x128xf32>
    %c0_26 = arith.constant 0 : index
    %c0_27 = arith.constant 0 : index
    %56 = vector.load %arg11[%c0_26, %c0_27] : memref<8x128xf32, #tpu.memory_space<vmem>>, vector<8x128xf32>
    tpu.vector_store %arg11[%c0_26, %c0_27], %55 {strides = array<i32>} : memref<8x128xf32, #tpu.memory_space<vmem>>, vector<8x128xf32>,
    return
  }
  func.func @transform_0(%arg0: i32) -> i32 {
    %c0_i32 = arith.constant 0 : i32
    %c0_i32_0 = arith.constant 0 : i32
    return %c0_i32 : i32
  }
  func.func @transform_1(%arg0: i32) -> (i32, i32) {
    %c0_i32 = arith.constant 0 : i32
    %c0_i32_0 = arith.constant 0 : i32
    return %arg0, %c0_i32 : i32, i32
  }
  func.func @transform_2(%arg0: i32) -> (i32, i32) {
    %c0_i32 = arith.constant 0 : i32
    %c0_i32_0 = arith.constant 0 : i32
    %c0_i32_1 = arith.constant 0 : i32
    return %c0_i32, %c0_i32_0 : i32, i32
  }
  func.func @transform_3(%arg0: i32) -> (i32, i32) {
    %c0_i32 = arith.constant 0 : i32
    %c0_i32_0 = arith.constant 0 : i32
    %c0_i32_1 = arith.constant 0 : i32
    return %c0_i32, %c0_i32_0 : i32, i32
  }
  func.func @transform_4(%arg0: i32) -> (i32, i32) {
    %c0_i32 = arith.constant 0 : i32
    %c0_i32_0 = arith.constant 0 : i32
    %c0_i32_1 = arith.constant 0 : i32
    return %c0_i32, %c0_i32_0 : i32, i32
  }
  func.func @transform_5(%arg0: i32) -> (i32, i32) {
    %c0_i32 = arith.constant 0 : i32
    %c0_i32_0 = arith.constant 0 : i32
    %c0_i32_1 = arith.constant 0 : i32
    return %c0_i32, %c0_i32_0 : i32, i32
  }
  func.func @transform_6(%arg0: i32) -> (i32, i32) {
    %c0_i32 = arith.constant 0 : i32
    %c0_i32_0 = arith.constant 0 : i32
    %c0_i32_1 = arith.constant 0 : i32
    return %c0_i32, %c0_i32_0 : i32, i32
  }
  func.func @transform_7(%arg0: i32) -> (i32, i32) {
    %c0_i32 = arith.constant 0 : i32
    %c0_i32_0 = arith.constant 0 : i32
    %c0_i32_1 = arith.constant 0 : i32
    return %c0_i32, %c0_i32_0 : i32, i32
  }
  func.func @transform_8(%arg0: i32) -> (i32, i32) {
    %c0_i32 = arith.constant 0 : i32
    %c0_i32_0 = arith.constant 0 : i32
    %c0_i32_1 = arith.constant 0 : i32
    return %c0_i32, %c0_i32_0 : i32, i32
  }
  func.func @transform_9(%arg0: i32) -> (i32, i32) {
    %c0_i32 = arith.constant 0 : i32
    %c0_i32_0 = arith.constant 0 : i32
    %c0_i32_1 = arith.constant 0 : i32
    return %c0_i32, %c0_i32_0 : i32, i32
  }
  func.func @transform_10(%arg0: i32) -> (i32, i32) {
    %c0_i32 = arith.constant 0 : i32
    %c0_i32_0 = arith.constant 0 : i32
    return %arg0, %c0_i32 : i32, i32
  }
}

</mosaic_0001>

<bundles_post_ra>
// kernel: neural_network_forward.1
= control target key start
LH: loop header
LB: loop body
LE: loop exit
PB: predicated region body
PF: predicated region fallthrough
CT: control target
= control target key end

     0   :  { %15 = vsyncpa [#allocation5], 0  ;;  %s5667_s0 = inlined_call_operand.vmem [shape: f32[3], index: 0, kind: input, shape index: {}]   ;;  %s5668_s1 = inlined_call_operand.vmem [shape: f32[8,784], index: 1, kind: input, shape index: {}]   ;;  %s5669_s2 = inlined_call_operand.hbm [shape: bf16[784,512], index: 2, kind: input, shape index: {}]   ;;  %s5670_s3 = inlined_call_operand.vmem [shape: f32[1,512], index: 3, kind: input, shape index: {}]   ;;  %s5671_s4 = inlined_call_operand.hbm [shape: bf16[512,512], index: 4, kind: input, shape index: {}]   ;;  %s5672_s5 = inlined_call_operand.vmem [shape: f32[1,512], index: 5, kind: input, shape index: {}]   ;;  %s5673_s6 = inlined_call_operand.hbm [shape: bf16[512,512], index: 6, kind: input, shape index: {}]   ;;  %s5674_s7 = inlined_call_operand.vmem [shape: f32[1,512], index: 7, kind: input, shape index: {}]   ;;  %s5675_s8 = inlined_call_operand.vmem [shape: bf16[512,128], index: 8, kind: input, shape index: {}]   ;;  %s5676_s9 = inlined_call_operand.vmem [shape: f32[1,128], index: 9, kind: input, shape index: {}]   ;;  %s5677_s10 = inlined_call_operand.hbm [shape: f32[8,128], index: 10, kind: output, shape index: {}]  }
   0x1   :  { %16 = vsyncpa [#allocation3], 0 }
   0x2   :  { %17 = vsyncpa [#allocation8], 0 }
   0x3   :  { %18 = vsyncpa [#allocation4], 0  ;;  %s25_s15 = sshll.u32 %s5667_s0, 4  ;;  %s5329_s16 = smov [#allocation7]   ;;  %s26_s15 = int_to_ptr.vmem [resolvable:$true] %s25_s15 }
   0x4   :  { %s50_s17 = sshll.u32 %s5329_s16, 4  ;;  %s51_s17 = int_to_ptr.vmem [resolvable:$true] %s50_s17 }
   0x5   :  { %s5237_s18 = scalar_lea.vmem %s51_s17, 16384  ;;  %p5242_p1 = scmp.lt.s32.totalorder %s51_s17, %s51_s17 }
   0x6   :  { %p5238_p0 = scmp.ne.s32.totalorder %s51_s17, %s5237_s18  ;;  %p5243_p2 = scmp.lt.s32.totalorder %s5237_s18, %s5237_s18 }
   0x8   :  { %p5244_p3 = por %p5243_p2, %p5242_p1 }
   0xa   :  { %p5245_p4 = pnand %p5244_p3, %p5238_p0 }
   0xc   :  { %5248 = shalt.err (!%p5245_p4)
}
   0xd   :  { %s5330_s19 = smov 256   ;;  %s5331_s20 = smov 16  }
   0xe   :  { %56 = dma.hbm_to_vmem [thread:$0]  %s5671_s4, 16384, %s51_s17, [#allocation8], %s5330_s19, %s5330_s19, %s5331_s20  }
   0xf   :  { %s5249_s0 = scalar_lea.vmem %s26_s15, 16  ;;  %p5254_p6 = scmp.lt.s32.totalorder %s26_s15, %s26_s15 }
  0x10   :  { %p5250_p5 = scmp.ne.s32.totalorder %s26_s15, %s5249_s0  ;;  %p5255_p7 = scmp.lt.s32.totalorder %s5249_s0, %s5249_s0 }
  0x12   :  { %p5256_p8 = por %p5255_p7, %p5254_p6 }
  0x14   :  { %p5257_p9 = pnand %p5256_p8, %p5250_p5 }
  0x16   :  { %5260 = shalt.err (!%p5257_p9)
}
  0x17   :  { %s5332_s23 = smov [#allocation2]   ;;  %s5333_s24 = smov [#allocation6]  }
  0x18   :  { %28 = dma.vmem_to_smem %s26_s15, 16, %s5332_s23, [#allocation5]  }
  0x19   :  { %s36_s25 = sshll.u32 %s5333_s24, 4  ;;  %s5334_s26 = smov [#allocation9]   ;;  %s37_s25 = int_to_ptr.vmem [resolvable:$true] %s36_s25 }
  0x1a   :  { %s64_s27 = sshll.u32 %s5334_s26, 4  ;;  %s5269_s28 = scalar_lea.vmem %s37_s25, 25088  ;;  %s65_s27 = int_to_ptr.vmem [resolvable:$true] %s64_s27 }
  0x1b   :  { %p5270_p10 = scmp.ne.s32.totalorder %s37_s25, %s5269_s28  ;;  %p5274_p11 = scmp.lt.s32.totalorder %s37_s25, %s37_s25 }
  0x1c   :  { %p5275_p12 = scmp.lt.s32.totalorder %s5269_s28, %s5269_s28 }
  0x1e   :  { %p5276_p13 = por %p5275_p12, %p5274_p11 }
  0x20   :  { %p5277_p0 = pnand %p5276_p13, %p5270_p10 }
  0x22   :  { %5280 = shalt.err (!%p5277_p0)
}
  0x23   :  { %42 = dma.hbm_to_vmem [thread:$0]  %s5669_s2, 25088, %s37_s25, [#allocation3], %s5330_s19, %s5330_s19, %s5331_s20  }
  0x24   :  { %s5289_s30 = scalar_lea.vmem %s65_s27, 16384  ;;  %p5294_p2 = scmp.lt.s32.totalorder %s65_s27, %s65_s27 }
  0x25   :  { %p5290_p1 = scmp.ne.s32.totalorder %s65_s27, %s5289_s30  ;;  %p5295_p3 = scmp.lt.s32.totalorder %s5289_s30, %s5289_s30 }
  0x27   :  { %p5296_p4 = por %p5295_p3, %p5294_p2 }
  0x29   :  { %p5297_p5 = pnand %p5296_p4, %p5290_p1 }
  0x2b   :  { %5300 = shalt.err (!%p5297_p5)
}
  0x2c   :  { %70 = dma.hbm_to_vmem [thread:$0]  %s5673_s6, 16384, %s65_s27, [#allocation8], %s5330_s19, %s5330_s19, %s5331_s20  }
  0x2d   :  { %5321 = dma.done.wait [#allocation5], 16  }
  0x2e   :  { %5322 = vsyncadd [#allocation5], 4294967280 }
  0x2f   :  { %5323 = dma.done.wait [#allocation3], 25088  }
  0x30   :  { %5324 = vsyncadd [#allocation3], 4294942208 }
  0x31   :  { %5325 = dma.done.wait [#allocation8], 32768  }
  0x32   :  { %5326 = vsyncadd [#allocation8], 4294934528 }
  0x33   :  { %89 = sfence }
  0x34   :  { %v4515_v0 = vld [vmem:[#allocation6 + $0xe4] ss:$16 sps:$4 sm:$0xff]   ;;  %v4519_v2 = vld [vmem:[#allocation6 + $0xe0] ss:$16 sps:$4 sm:$0xff]   ;;  %v95_v46 = vld [vmem:[%s5668_s1 + $0x8] sm:$0xff]  ;;  %vm1306_vm0 = vcmask 130048  }
  0x35   :  { %v4517_v1 = vld [vmem:[#allocation6 + $0x2e4] ss:$16 sps:$4 sm:$0xff]   ;;  %1310 = vmatprep.subr.bf16.mxu0 %v4515_v0  ;;  %v4520_v3 = vld [vmem:[#allocation6 + $0x2e0] ss:$16 sps:$4 sm:$0xff]   ;;  %v5416_v49 = vpack.c.bf16 %v95_v46, %v95_v46  ;;  %v97_v50 = vld [vmem:[%s5668_s1 + $0x18] sm:$0xff]  ;;  %s91_s25 = sld [smem:[#allocation2]] }
  0x36   :  { %1351 = vmatprep.subr.bf16.mxu1 %v4517_v1  ;;  %v4521_v4 = vld [vmem:[#allocation6 + $0xc4] ss:$16 sps:$4 sm:$0xff]   ;;  %1311 = vmatpush1.bf16.msra.mxu0 %v4519_v2  ;;  %v4525_v6 = vld [vmem:[#allocation6 + $0xc0] ss:$16 sps:$4 sm:$0xff]   ;;  %v5421_v52 = vpack.c.bf16 %v97_v50, %v97_v50  ;;  %s3975_s16 = sld [smem:[#allocation2 + $0x2]]  ;;  %s5336_s20 = smov [#allocation10]  }
  0x37   :  { %1352 = vmatpush1.bf16.msra.mxu1 %v4520_v3  ;;  %v4523_v5 = vld [vmem:[#allocation6 + $0x2c4] ss:$16 sps:$4 sm:$0xff]   ;;  %1312 = vmatprep.subr.bf16.mxu0 %v4521_v4  ;;  %v4526_v7 = vld [vmem:[#allocation6 + $0x2c0] ss:$16 sps:$4 sm:$0xff]   ;;  %s3963_s21 = sshll.u32 %s5336_s20, 4  ;;  %s3964_s21 = int_to_ptr.vmem [resolvable:$true] %s3963_s21 }
  0x38   :  { %1353 = vmatprep.subr.bf16.mxu1 %v4523_v5  ;;  %v4527_v8 = vld [vmem:[#allocation6 + $0xa4] ss:$16 sps:$4 sm:$0xff]   ;;  %v4531_v10 = vld [vmem:[#allocation6 + $0xa0] ss:$16 sps:$4 sm:$0xff]   ;;  %1342 = vmatprep.mubr.bf16.mxu0 %v5416_v49  ;;  %p5306_p7 = scmp.lt.s32.totalorder %s3964_s21, %s3964_s21 }
  0x39   :  { %v4529_v9 = vld [vmem:[#allocation6 + $0x2a4] ss:$16 sps:$4 sm:$0xff]   ;;  %v4532_v11 = vld [vmem:[#allocation6 + $0x2a0] ss:$16 sps:$4 sm:$0xff]   ;;  %1383 = vmatprep.mubr.bf16.mxu1 %v5421_v52 }
  0x3a   :  { %1313 = vmatpush1.bf16.msra.mxu0 %v4525_v6  ;;  %v4533_v12 = vld [vmem:[#allocation6 + $0x84] ss:$16 sps:$4 sm:$0xff]   ;;  %v4537_v14 = vld [vmem:[#allocation6 + $0x80] ss:$16 sps:$4 sm:$0xff]  }
  0x3b   :  { %1354 = vmatpush1.bf16.msra.mxu1 %v4526_v7  ;;  %1314 = vmatprep.subr.bf16.mxu0 %v4527_v8  ;;  %v4535_v13 = vld [vmem:[#allocation6 + $0x284] ss:$16 sps:$4 sm:$0xff]   ;;  %v4538_v15 = vld [vmem:[#allocation6 + $0x280] ss:$16 sps:$4 sm:$0xff]   ;;  %s1638_s26 = ssub.f32 0.0, %s91_s25 }
  0x3c   :  { %1355 = vmatprep.subr.bf16.mxu1 %v4529_v9  ;;  %v4539_v16 = vld [vmem:[#allocation6 + $0x64] ss:$16 sps:$4 sm:$0xff]   ;;  %v4543_v18 = vld [vmem:[#allocation6 + $0x60] ss:$16 sps:$4 sm:$0xff]   ;;  %s3584_s19 = ssub.f32 0.0, %s3975_s16 }
  0x3d   :  { %v4541_v17 = vld [vmem:[#allocation6 + $0x264] ss:$16 sps:$4 sm:$0xff]   ;;  %v4544_v19 = vld [vmem:[#allocation6 + $0x260] ss:$16 sps:$4 sm:$0xff]  }
  0x3e   :  { %1315 = vmatpush1.bf16.msra.mxu0 %v4531_v10  ;;  %v4545_v20 = vld [vmem:[#allocation6 + $0x44] ss:$16 sps:$4 sm:$0xff]   ;;  %v4549_v22 = vld [vmem:[#allocation6 + $0x40] ss:$16 sps:$4 sm:$0xff]  }
  0x3f   :  { %1356 = vmatpush1.bf16.msra.mxu1 %v4532_v11  ;;  %1316 = vmatprep.subr.bf16.mxu0 %v4533_v12  ;;  %v4547_v21 = vld [vmem:[#allocation6 + $0x244] ss:$16 sps:$4 sm:$0xff]   ;;  %v4550_v23 = vld [vmem:[#allocation6 + $0x240] ss:$16 sps:$4 sm:$0xff]  }
  0x40   :  { %1357 = vmatprep.subr.bf16.mxu1 %v4535_v13  ;;  %v4551_v24 = vld [vmem:[#allocation6 + $0x24] ss:$16 sps:$4 sm:$0xff]   ;;  %v4555_v26 = vld [vmem:[#allocation6 + $0x20] ss:$16 sps:$4 sm:$0xff]   ;;  %v4622_v13 = vld [vmem:[#allocation6 + $0xec] ss:$16 sps:$4 sm:$0xff]  }
  0x41   :  { %v4553_v25 = vld [vmem:[#allocation6 + $0x224] ss:$16 sps:$4 sm:$0xff]   ;;  %v4556_v27 = vld [vmem:[#allocation6 + $0x220] ss:$16 sps:$4 sm:$0xff]  }
  0x42   :  { %1317 = vmatpush1.bf16.msra.mxu0 %v4537_v14  ;;  %v4557_v28 = vld [vmem:[#allocation6 + $0x4] ss:$16 sps:$4 sm:$0xff]   ;;  %v4561_v30 = vld [vmem:[#allocation6] ss:$16 sps:$4 sm:$0xff]  }
  0x43   :  { %1358 = vmatpush1.bf16.msra.mxu1 %v4538_v15  ;;  %1318 = vmatprep.subr.bf16.mxu0 %v4539_v16  ;;  %v4559_v29 = vld [vmem:[#allocation6 + $0x204] ss:$16 sps:$4 sm:$0xff]   ;;  %v4562_v31 = vld [vmem:[#allocation6 + $0x200] ss:$16 sps:$4 sm:$0xff]   ;;  %v5335_v16 = vmov 0  }
  0x44   :  { %1359 = vmatprep.subr.bf16.mxu1 %v4541_v17  ;;  %v4563_v32 = vld [vmem:[#allocation6 + $0x1e4] ss:$16 sps:$4 sm:$0xff]   ;;  %v4567_v34 = vld [vmem:[#allocation6 + $0x1e0] ss:$16 sps:$4 sm:$0xff]  }
  0x45   :  { %v4565_v33 = vld [vmem:[#allocation6 + $0x3e4] ss:$16 sps:$4 sm:$0xff]   ;;  %v4568_v35 = vld [vmem:[#allocation6 + $0x3e0] ss:$16 sps:$4 sm:$0xff]  }
  0x46   :  { %1319 = vmatpush1.bf16.msra.mxu0 %v4543_v18  ;;  %v4569_v36 = vld [vmem:[#allocation6 + $0x1c4] ss:$16 sps:$4 sm:$0xff]   ;;  %v4573_v38 = vld [vmem:[#allocation6 + $0x1c0] ss:$16 sps:$4 sm:$0xff]   ;;  %v4620_v18 = vld [vmem:[#allocation6 + $0xe8] ss:$16 sps:$4 sm:$0xff]  }
  0x47   :  { %1360 = vmatpush1.bf16.msra.mxu1 %v4544_v19  ;;  %1320 = vmatprep.subr.bf16.mxu0 %v4545_v20  ;;  %v4571_v37 = vld [vmem:[#allocation6 + $0x3c4] ss:$16 sps:$4 sm:$0xff]   ;;  %v4574_v39 = vld [vmem:[#allocation6 + $0x3c0] ss:$16 sps:$4 sm:$0xff]  }
  0x48   :  { %1361 = vmatprep.subr.bf16.mxu1 %v4547_v21  ;;  %v4575_v40 = vld [vmem:[#allocation6 + $0x1a4] ss:$16 sps:$4 sm:$0xff]   ;;  %v4579_v42 = vld [vmem:[#allocation6 + $0x1a0] ss:$16 sps:$4 sm:$0xff]   ;;  %v4628_v21 = vld [vmem:[#allocation6 + $0xcc] ss:$16 sps:$4 sm:$0xff]  }
  0x49   :  { %v4577_v41 = vld [vmem:[#allocation6 + $0x3a4] ss:$16 sps:$4 sm:$0xff]   ;;  %v4580_v43 = vld [vmem:[#allocation6 + $0x3a0] ss:$16 sps:$4 sm:$0xff]  }
  0x4a   :  { %1321 = vmatpush1.bf16.msra.mxu0 %v4549_v22  ;;  %v4581_v44 = vld [vmem:[#allocation6 + $0x184] ss:$16 sps:$4 sm:$0xff]   ;;  %v4585_v47 = vld [vmem:[#allocation6 + $0x180] ss:$16 sps:$4 sm:$0xff]  }
  0x4b   :  { %1362 = vmatpush1.bf16.msra.mxu1 %v4550_v23  ;;  %1322 = vmatprep.subr.bf16.mxu0 %v4551_v24  ;;  %v4583_v45 = vld [vmem:[#allocation6 + $0x384] ss:$16 sps:$4 sm:$0xff]   ;;  %v4586_v48 = vld [vmem:[#allocation6 + $0x380] ss:$16 sps:$4 sm:$0xff]   ;;  %v4626_v23 = vld [vmem:[#allocation6 + $0xc8] ss:$16 sps:$4 sm:$0xff]  }
  0x4c   :  { %1363 = vmatprep.subr.bf16.mxu1 %v4553_v25  ;;  %v4587_v51 = vld [vmem:[#allocation6 + $0x164] ss:$16 sps:$4 sm:$0xff]   ;;  %v4591_v54 = vld [vmem:[#allocation6 + $0x160] ss:$16 sps:$4 sm:$0xff]   ;;  %v4634_v25 = vld [vmem:[#allocation6 + $0xac] ss:$16 sps:$4 sm:$0xff]  }
  0x4d   :  { %v4589_v53 = vld [vmem:[#allocation6 + $0x364] ss:$16 sps:$4 sm:$0xff]   ;;  %v4592_v55 = vld [vmem:[#allocation6 + $0x360] ss:$16 sps:$4 sm:$0xff]  }
  0x4e   :  { %1323 = vmatpush1.bf16.msra.mxu0 %v4555_v26  ;;  %v4593_v56 = vld [vmem:[#allocation6 + $0x144] ss:$16 sps:$4 sm:$0xff]   ;;  %v4597_v58 = vld [vmem:[#allocation6 + $0x140] ss:$16 sps:$4 sm:$0xff]  }
  0x4f   :  { %1364 = vmatpush1.bf16.msra.mxu1 %v4556_v27  ;;  %1324 = vmatprep.subr.bf16.mxu0 %v4557_v28  ;;  %v4595_v57 = vld [vmem:[#allocation6 + $0x344] ss:$16 sps:$4 sm:$0xff]   ;;  %v4598_v59 = vld [vmem:[#allocation6 + $0x340] ss:$16 sps:$4 sm:$0xff]   ;;  %v4632_v27 = vld [vmem:[#allocation6 + $0xa8] ss:$16 sps:$4 sm:$0xff]  }
  0x50   :  { %1365 = vmatprep.subr.bf16.mxu1 %v4559_v29  ;;  %v4599_v60 = vld [vmem:[#allocation6 + $0x124] ss:$16 sps:$4 sm:$0xff]   ;;  %v4603_v62 = vld [vmem:[#allocation6 + $0x120] ss:$16 sps:$4 sm:$0xff]   ;;  %v4640_v29 = vld [vmem:[#allocation6 + $0x8c] ss:$16 sps:$4 sm:$0xff]  }
  0x51   :  { %v4601_v61 = vld [vmem:[#allocation6 + $0x324] ss:$16 sps:$4 sm:$0xff]   ;;  %v4604_v63 = vld [vmem:[#allocation6 + $0x320] ss:$16 sps:$4 sm:$0xff]  }
  0x52   :  { %1325 = vmatpush1.bf16.msra.mxu0 %v4561_v30  ;;  %v4605_v0 = vld [vmem:[#allocation6 + $0x104] ss:$16 sps:$4 sm:$0xff]   ;;  %v4609_v2 = vld [vmem:[#allocation6 + $0x100] ss:$16 sps:$4 sm:$0xff]  }
  0x53   :  { %1366 = vmatpush1.bf16.msra.mxu1 %v4562_v31  ;;  %1326 = vmatprep.subr.bf16.mxu0 %v4563_v32  ;;  %v4607_v1 = vld [vmem:[#allocation6 + $0x304] ss:$16 sps:$4 sm:$0xff]   ;;  %v4610_v3 = vld [vmem:[#allocation6 + $0x300] ss:$16 sps:$4 sm:$0xff]   ;;  %v4638_v31 = vld [vmem:[#allocation6 + $0x88] ss:$16 sps:$4 sm:$0xff]  }
  0x54   :  { %1367 = vmatprep.subr.bf16.mxu1 %v4565_v33  ;;  %v94_v4 = vld [vmem:[%s5668_s1] sm:$0xff]  ;;  %v96_v5 = vld [vmem:[%s5668_s1 + $0x10] sm:$0xff]  ;;  %v4646_v33 = vld [vmem:[#allocation6 + $0x6c] ss:$16 sps:$4 sm:$0xff]  }
  0x55   :  { %v4613_v6 = vld [vmem:[#allocation6 + $0x4e4] ss:$16 sps:$4 sm:$0xff]   ;;  %v5431_v8 = vpack.c.bf16 %v94_v4, %v94_v4  ;;  %v5433_v9 = vpack.c.bf16 %v96_v5, %v96_v5  ;;  %v4611_v10 = vld [vmem:[#allocation6 + $0x4e0] ss:$16 sps:$4 sm:$0xff]   ;;  %v4694_v4 = vld [vmem:[#allocation6 + $0x16c] ss:$16 sps:$4 sm:$0xff]  }
  0x56   :  { %1327 = vmatpush2.bf16.msra.mxu0 %v4567_v34  ;;  %v4616_v7 = vld [vmem:[#allocation6 + $0x604] ss:$16 sps:$4 sm:$0xff]   ;;  %v4614_v11 = vld [vmem:[#allocation6 + $0x600] ss:$16 sps:$4 sm:$0xff]  }
  0x57   :  { %1368 = vmatpush2.bf16.msra.mxu1 %v4568_v35  ;;  %1328 = vmatprep.subr.bf16.mxu0 %v4569_v36  ;;  %v4619_v12 = vld [vmem:[#allocation6 + $0x4c4] ss:$16 sps:$4 sm:$0xff]   ;;  %v4617_v14 = vld [vmem:[#allocation6 + $0x4c0] ss:$16 sps:$4 sm:$0xff]   ;;  %v99_v35 = vld [vmem:[%s5668_s1 + $0x28] sm:$0xff] }
  0x58   :  { %1369 = vmatprep.subr.bf16.mxu1 %v4571_v37  ;;  %v100_v15 = vld [vmem:[%s5668_s1 + $0x30] sm:$0xff]  ;;  %v5449_v36 = vpack.c.bf16 %v99_v35, %v99_v35  ;;  %v4644_v37 = vld [vmem:[#allocation6 + $0x68] ss:$16 sps:$4 sm:$0xff]   ;;  %v4733_v35 = vld [vmem:[#allocation6 + $0x26c] ss:$16 sps:$4 sm:$0xff]  }
  0x59   :  { %v4625_v17 = vld [vmem:[#allocation6 + $0x4a4] ss:$16 sps:$4 sm:$0xff]   ;;  %v5441_v19 = vpack.c.bf16 %v100_v15, %v100_v15  ;;  %v4623_v20 = vld [vmem:[#allocation6 + $0x4a0] ss:$16 sps:$4 sm:$0xff]  }
  0x5a   :  { %1329 = vmatpush2.bf16.msra.mxu0 %v4573_v38  ;;  %v4631_v22 = vld [vmem:[#allocation6 + $0x484] ss:$16 sps:$4 sm:$0xff]   ;;  %v4629_v24 = vld [vmem:[#allocation6 + $0x480] ss:$16 sps:$4 sm:$0xff]  }
  0x5b   :  { %1370 = vmatpush2.bf16.msra.mxu1 %v4574_v39  ;;  %1330 = vmatprep.subr.bf16.mxu0 %v4575_v40  ;;  %v4637_v26 = vld [vmem:[#allocation6 + $0x464] ss:$16 sps:$4 sm:$0xff]   ;;  %v4635_v28 = vld [vmem:[#allocation6 + $0x460] ss:$16 sps:$4 sm:$0xff]   ;;  %v4652_v39 = vld [vmem:[#allocation6 + $0x4c] ss:$16 sps:$4 sm:$0xff]  }
  0x5c   :  { %1371 = vmatprep.subr.bf16.mxu1 %v4577_v41  ;;  %v4643_v30 = vld [vmem:[#allocation6 + $0x444] ss:$16 sps:$4 sm:$0xff]   ;;  %v4641_v32 = vld [vmem:[#allocation6 + $0x440] ss:$16 sps:$4 sm:$0xff]   ;;  %v4650_v41 = vld [vmem:[#allocation6 + $0x48] ss:$16 sps:$4 sm:$0xff]  }
  0x5d   :  { %v4649_v34 = vld [vmem:[#allocation6 + $0x424] ss:$16 sps:$4 sm:$0xff]   ;;  %v4647_v38 = vld [vmem:[#allocation6 + $0x420] ss:$16 sps:$4 sm:$0xff]  }
  0x5e   :  { %1331 = vmatpush2.bf16.msra.mxu0 %v4579_v42  ;;  %v4655_v40 = vld [vmem:[#allocation6 + $0x404] ss:$16 sps:$4 sm:$0xff]   ;;  %v4653_v42 = vld [vmem:[#allocation6 + $0x400] ss:$16 sps:$4 sm:$0xff]  }
  0x5f   :  { %1372 = vmatpush2.bf16.msra.mxu1 %v4580_v43  ;;  %1332 = vmatprep.subr.bf16.mxu0 %v4581_v44  ;;  %v4658_v43 = vld [vmem:[#allocation6 + $0x2c] ss:$16 sps:$4 sm:$0xff]   ;;  %v4661_v44 = vld [vmem:[#allocation6 + $0x5e4] ss:$16 sps:$4 sm:$0xff]   ;;  %v4659_v46 = vld [vmem:[#allocation6 + $0x5e0] ss:$16 sps:$4 sm:$0xff]  }
  0x60   :  { %1373 = vmatprep.subr.bf16.mxu1 %v4583_v45  ;;  %v4656_v45 = vld [vmem:[#allocation6 + $0x28] ss:$16 sps:$4 sm:$0xff]   ;;  %v4665_v50 = vld [vmem:[#allocation6 + $0x5c0] ss:$16 sps:$4 sm:$0xff]   ;;  %v4697_v5 = vld [vmem:[#allocation6 + $0x524] ss:$16 sps:$4 sm:$0xff]  }
  0x61   :  { %v98_v15 = vld [vmem:[%s5668_s1 + $0x20] sm:$0xff] }
  0x62   :  { %1333 = vmatpush2.bf16.msra.mxu0 %v4585_v47  ;;  %v4664_v47 = vld [vmem:[#allocation6 + $0xc] ss:$16 sps:$4 sm:$0xff]  }
  0x63   :  { %1374 = vmatpush2.bf16.msra.mxu1 %v4586_v48  ;;  %1334 = vmatprep.subr.bf16.mxu0 %v4587_v51  ;;  %v4667_v48 = vld [vmem:[#allocation6 + $0x5c4] ss:$16 sps:$4 sm:$0xff]   ;;  %v4670_v51 = vld [vmem:[#allocation6 + $0x1ec] ss:$16 sps:$4 sm:$0xff]  }
  0x64   :  { %1375 = vmatprep.subr.bf16.mxu1 %v4589_v53  ;;  %v4673_v53 = vld [vmem:[#allocation6 + $0x5a4] ss:$16 sps:$4 sm:$0xff]  }
  0x66   :  { %1335 = vmatpush2.bf16.msra.mxu0 %v4591_v54  ;;  %v4668_v54 = vld [vmem:[#allocation6 + $0x1e8] ss:$16 sps:$4 sm:$0xff]  }
  0x67   :  { %1376 = vmatpush2.bf16.msra.mxu1 %v4592_v55  ;;  %1336 = vmatprep.subr.bf16.mxu0 %v4593_v56  ;;  %v4671_v55 = vld [vmem:[#allocation6 + $0x5a0] ss:$16 sps:$4 sm:$0xff]   ;;  %v4676_v56 = vld [vmem:[#allocation6 + $0x1cc] ss:$16 sps:$4 sm:$0xff]  }
  0x68   :  { %1377 = vmatprep.subr.bf16.mxu1 %v4595_v57  ;;  %v4679_v57 = vld [vmem:[#allocation6 + $0x584] ss:$16 sps:$4 sm:$0xff]  }
  0x6a   :  { %1337 = vmatpush2.bf16.msra.mxu0 %v4597_v58  ;;  %v4674_v58 = vld [vmem:[#allocation6 + $0x1c8] ss:$16 sps:$4 sm:$0xff]  }
  0x6b   :  { %1378 = vmatpush2.bf16.msra.mxu1 %v4598_v59  ;;  %1338 = vmatprep.subr.bf16.mxu0 %v4599_v60  ;;  %v4677_v59 = vld [vmem:[#allocation6 + $0x580] ss:$16 sps:$4 sm:$0xff]   ;;  %v4682_v60 = vld [vmem:[#allocation6 + $0x1ac] ss:$16 sps:$4 sm:$0xff]  }
  0x6c   :  { %1379 = vmatprep.subr.bf16.mxu1 %v4601_v61  ;;  %v4685_v61 = vld [vmem:[#allocation6 + $0x564] ss:$16 sps:$4 sm:$0xff]  }
  0x6e   :  { %1339 = vmatpush2.bf16.msra.mxu0 %v4603_v62  ;;  %v4680_v62 = vld [vmem:[#allocation6 + $0x1a8] ss:$16 sps:$4 sm:$0xff]  }
  0x6f   :  { %1380 = vmatpush2.bf16.msra.mxu1 %v4604_v63  ;;  %1340 = vmatprep.subr.bf16.mxu0 %v4605_v0  ;;  %v4683_v63 = vld [vmem:[#allocation6 + $0x560] ss:$16 sps:$4 sm:$0xff]   ;;  %v4688_v0 = vld [vmem:[#allocation6 + $0x18c] ss:$16 sps:$4 sm:$0xff]  }
  0x70   :  { %1381 = vmatprep.subr.bf16.mxu1 %v4607_v1  ;;  %v4691_v1 = vld [vmem:[#allocation6 + $0x544] ss:$16 sps:$4 sm:$0xff]  }
  0x72   :  { %1341 = vmatpush2.bf16.msra.mxu0 %v4609_v2  ;;  %v4686_v2 = vld [vmem:[#allocation6 + $0x188] ss:$16 sps:$4 sm:$0xff]  }
  0x73   :  { %1382 = vmatpush2.bf16.msra.mxu1 %v4610_v3  ;;  %1392 = vmatprep.subr.bf16.mxu0 %v4613_v6  ;;  %v4689_v3 = vld [vmem:[#allocation6 + $0x540] ss:$16 sps:$4 sm:$0xff]   ;;  %v4692_v6 = vld [vmem:[#allocation6 + $0x168] ss:$16 sps:$4 sm:$0xff]  }
  0x74   :  { %1447 = vmatprep.subr.bf16.mxu1 %v4616_v7  ;;  %v4695_v7 = vld [vmem:[#allocation6 + $0x520] ss:$16 sps:$4 sm:$0xff]  }
  0x75   :  { %1343 = vmatmul.mubr.bf16.vlgmr.msra.gmra.mxu0 %v5431_v8 }
  0x76   :  { %1384 = vmatmul.mubr.bf16.vlgmr.msra.gmra.mxu1 %v5433_v9  ;;  %1393 = vmatpush1.bf16.msra.mxu0 %v4611_v10  ;;  %v4700_v10 = vld [vmem:[#allocation6 + $0x14c] ss:$16 sps:$4 sm:$0xff]  }
  0x77   :  { %1448 = vmatpush1.bf16.msra.mxu1 %v4614_v11  ;;  %1394 = vmatprep.subr.bf16.mxu0 %v4619_v12  ;;  %v4703_v11 = vld [vmem:[#allocation6 + $0x504] ss:$16 sps:$4 sm:$0xff]   ;;  %v4698_v12 = vld [vmem:[#allocation6 + $0x148] ss:$16 sps:$4 sm:$0xff]  }
  0x78   :  { %1465 = vmatprep.mubr.bf16.mxu1 %v5335_v16  ;;  %1474 = vmatprep.subr.bf16.mxu1 %v4622_v13  ;;  %v4701_v13 = vld [vmem:[#allocation6 + $0x500] ss:$16 sps:$4 sm:$0xff]  }
  0x79   :  { %1424 = vmatprep.mubr.bf16.mxu0 %v5449_v36 }
  0x7a   :  { %1395 = vmatpush1.bf16.msra.mxu0 %v4617_v14  ;;  %v4706_v14 = vld [vmem:[#allocation6 + $0x12c] ss:$16 sps:$4 sm:$0xff]  }
  0x7b   :  { %1396 = vmatprep.subr.bf16.mxu0 %v4625_v17  ;;  %v4709_v17 = vld [vmem:[#allocation6 + $0x2ec] ss:$16 sps:$4 sm:$0xff]  }
  0x7e   :  { %4172 = vmatmul.mubr.msk.bf16.vlgmr.msra.gmra.mxu1 %vm1306_vm0, %v5441_v19  ;;  %1397 = vmatpush1.bf16.msra.mxu0 %v4623_v20  ;;  %v5455_v20 = vpack.c.bf16 %v98_v15, %v98_v15  ;;  %v4796_v15 = vld [vmem:[#allocation6 + $0x54c] ss:$16 sps:$4 sm:$0xff]  }
  0x7f   :  { %1475 = vmatpush1.bf16.msra.mxu1 %v4620_v18  ;;  %1398 = vmatprep.subr.bf16.mxu0 %v4631_v22  ;;  %v4704_v18 = vld [vmem:[#allocation6 + $0x128] ss:$16 sps:$4 sm:$0xff]   ;;  %v4712_v22 = vld [vmem:[#allocation6 + $0x10c] ss:$16 sps:$4 sm:$0xff]  }
  0x80   :  { %1476 = vmatprep.subr.bf16.mxu1 %v4628_v21  ;;  %1506 = vmatprep.mubr.bf16.mxu1 %v5416_v49  ;;  %v4662_v49 = vld [vmem:[#allocation6 + $0x8] ss:$16 sps:$4 sm:$0xff]  }
  0x81   :  { %v4707_v21 = vld [vmem:[#allocation6 + $0x2e8] ss:$16 sps:$4 sm:$0xff]  }
  0x82   :  { %1399 = vmatpush1.bf16.msra.mxu0 %v4629_v24  ;;  %v4710_v24 = vld [vmem:[#allocation6 + $0x108] ss:$16 sps:$4 sm:$0xff]  }
  0x83   :  { %1477 = vmatpush1.bf16.msra.mxu1 %v4626_v23  ;;  %1400 = vmatprep.subr.bf16.mxu0 %v4637_v26  ;;  %v4715_v23 = vld [vmem:[#allocation6 + $0x2cc] ss:$16 sps:$4 sm:$0xff]  }
  0x84   :  { %1478 = vmatprep.subr.bf16.mxu1 %v4634_v25  ;;  %v4713_v25 = vld [vmem:[#allocation6 + $0x2c8] ss:$16 sps:$4 sm:$0xff]   ;;  %v4718_v26 = vld [vmem:[#allocation6 + $0x4ec] ss:$16 sps:$4 sm:$0xff]  }
  0x86   :  { %1401 = vmatpush1.bf16.msra.mxu0 %v4635_v28  ;;  %v4716_v28 = vld [vmem:[#allocation6 + $0x4e8] ss:$16 sps:$4 sm:$0xff]  }
  0x87   :  { %1479 = vmatpush1.bf16.msra.mxu1 %v4632_v27  ;;  %1402 = vmatprep.subr.bf16.mxu0 %v4643_v30  ;;  %v4721_v27 = vld [vmem:[#allocation6 + $0x2ac] ss:$16 sps:$4 sm:$0xff]  }
  0x88   :  { %1480 = vmatprep.subr.bf16.mxu1 %v4640_v29  ;;  %v4719_v29 = vld [vmem:[#allocation6 + $0x2a8] ss:$16 sps:$4 sm:$0xff]   ;;  %v4724_v30 = vld [vmem:[#allocation6 + $0x4cc] ss:$16 sps:$4 sm:$0xff]  }
  0x8a   :  { %1403 = vmatpush1.bf16.msra.mxu0 %v4641_v32  ;;  %v4722_v32 = vld [vmem:[#allocation6 + $0x4c8] ss:$16 sps:$4 sm:$0xff]  }
  0x8b   :  { %1481 = vmatpush1.bf16.msra.mxu1 %v4638_v31  ;;  %1404 = vmatprep.subr.bf16.mxu0 %v4649_v34  ;;  %v4727_v31 = vld [vmem:[#allocation6 + $0x28c] ss:$16 sps:$4 sm:$0xff]  }
  0x8c   :  { %1482 = vmatprep.subr.bf16.mxu1 %v4646_v33  ;;  %v4725_v33 = vld [vmem:[#allocation6 + $0x288] ss:$16 sps:$4 sm:$0xff]   ;;  %v4730_v34 = vld [vmem:[#allocation6 + $0x4ac] ss:$16 sps:$4 sm:$0xff]  }
  0x8e   :  { %1405 = vmatpush1.bf16.msra.mxu0 %v4647_v38  ;;  %v4731_v38 = vld [vmem:[#allocation6 + $0x268] ss:$16 sps:$4 sm:$0xff]  }
  0x8f   :  { %1483 = vmatpush1.bf16.msra.mxu1 %v4644_v37  ;;  %1406 = vmatprep.subr.bf16.mxu0 %v4655_v40  ;;  %v4728_v37 = vld [vmem:[#allocation6 + $0x4a8] ss:$16 sps:$4 sm:$0xff]  }
  0x90   :  { %1484 = vmatprep.subr.bf16.mxu1 %v4652_v39  ;;  %v4739_v39 = vld [vmem:[#allocation6 + $0x24c] ss:$16 sps:$4 sm:$0xff]   ;;  %v4734_v40 = vld [vmem:[#allocation6 + $0x488] ss:$16 sps:$4 sm:$0xff]  }
  0x92   :  { %1407 = vmatpush1.bf16.msra.mxu0 %v4653_v42  ;;  %v4745_v42 = vld [vmem:[#allocation6 + $0x22c] ss:$16 sps:$4 sm:$0xff]  }
  0x93   :  { %1485 = vmatpush1.bf16.msra.mxu1 %v4650_v41  ;;  %1408 = vmatprep.subr.bf16.mxu0 %v4661_v44  ;;  %v4742_v41 = vld [vmem:[#allocation6 + $0x46c] ss:$16 sps:$4 sm:$0xff]   ;;  %v4743_v44 = vld [vmem:[#allocation6 + $0x228] ss:$16 sps:$4 sm:$0xff]  }
  0x94   :  { %1486 = vmatprep.subr.bf16.mxu1 %v4658_v43  ;;  %v4740_v43 = vld [vmem:[#allocation6 + $0x468] ss:$16 sps:$4 sm:$0xff]  }
  0x96   :  { %1409 = vmatpush2.bf16.msra.mxu0 %v4659_v46  ;;  %v4746_v46 = vld [vmem:[#allocation6 + $0x448] ss:$16 sps:$4 sm:$0xff]  }
  0x97   :  { %1487 = vmatpush1.bf16.msra.mxu1 %v4656_v45  ;;  %1410 = vmatprep.subr.bf16.mxu0 %v4667_v48  ;;  %v4751_v45 = vld [vmem:[#allocation6 + $0x20c] ss:$16 sps:$4 sm:$0xff]  }
  0x98   :  { %1488 = vmatprep.subr.bf16.mxu1 %v4664_v47  ;;  %v4749_v47 = vld [vmem:[#allocation6 + $0x208] ss:$16 sps:$4 sm:$0xff]   ;;  %v4754_v48 = vld [vmem:[#allocation6 + $0x42c] ss:$16 sps:$4 sm:$0xff]  }
  0x9a   :  { %1411 = vmatpush2.bf16.msra.mxu0 %v4665_v50  ;;  %v4752_v50 = vld [vmem:[#allocation6 + $0x428] ss:$16 sps:$4 sm:$0xff]  }
  0x9b   :  { %1489 = vmatpush1.bf16.msra.mxu1 %v4662_v49  ;;  %1412 = vmatprep.subr.bf16.mxu0 %v4673_v53  ;;  %v4757_v49 = vld [vmem:[#allocation6 + $0x3ec] ss:$16 sps:$4 sm:$0xff]  }
  0x9c   :  { %1490 = vmatprep.subr.bf16.mxu1 %v4670_v51  ;;  %v4755_v51 = vld [vmem:[#allocation6 + $0x3e8] ss:$16 sps:$4 sm:$0xff]   ;;  %v4760_v53 = vld [vmem:[#allocation6 + $0x40c] ss:$16 sps:$4 sm:$0xff]  }
  0x9e   :  { %1413 = vmatpush2.bf16.msra.mxu0 %v4671_v55  ;;  %v4758_v55 = vld [vmem:[#allocation6 + $0x408] ss:$16 sps:$4 sm:$0xff]  }
  0x9f   :  { %1491 = vmatpush2.bf16.msra.mxu1 %v4668_v54  ;;  %1414 = vmatprep.subr.bf16.mxu0 %v4679_v57  ;;  %v4763_v54 = vld [vmem:[#allocation6 + $0x3cc] ss:$16 sps:$4 sm:$0xff]  }
  0xa0   :  { %1492 = vmatprep.subr.bf16.mxu1 %v4676_v56  ;;  %v4761_v56 = vld [vmem:[#allocation6 + $0x3c8] ss:$16 sps:$4 sm:$0xff]   ;;  %v4766_v57 = vld [vmem:[#allocation6 + $0x5ec] ss:$16 sps:$4 sm:$0xff]  }
  0xa2   :  { %1415 = vmatpush2.bf16.msra.mxu0 %v4677_v59  ;;  %v4764_v59 = vld [vmem:[#allocation6 + $0x5e8] ss:$16 sps:$4 sm:$0xff]  }
  0xa3   :  { %1493 = vmatpush2.bf16.msra.mxu1 %v4674_v58  ;;  %1416 = vmatprep.subr.bf16.mxu0 %v4685_v61  ;;  %v4769_v58 = vld [vmem:[#allocation6 + $0x3ac] ss:$16 sps:$4 sm:$0xff]  }
  0xa4   :  { %1494 = vmatprep.subr.bf16.mxu1 %v4682_v60  ;;  %v4767_v60 = vld [vmem:[#allocation6 + $0x3a8] ss:$16 sps:$4 sm:$0xff]   ;;  %v4772_v61 = vld [vmem:[#allocation6 + $0x5cc] ss:$16 sps:$4 sm:$0xff]  }
  0xa6   :  { %1417 = vmatpush2.bf16.msra.mxu0 %v4683_v63  ;;  %v4770_v63 = vld [vmem:[#allocation6 + $0x5c8] ss:$16 sps:$4 sm:$0xff]  }
  0xa7   :  { %1495 = vmatpush2.bf16.msra.mxu1 %v4680_v62  ;;  %1418 = vmatprep.subr.bf16.mxu0 %v4691_v1  ;;  %v4775_v62 = vld [vmem:[#allocation6 + $0x38c] ss:$16 sps:$4 sm:$0xff]  }
  0xa8   :  { %1496 = vmatprep.subr.bf16.mxu1 %v4688_v0  ;;  %v4773_v0 = vld [vmem:[#allocation6 + $0x388] ss:$16 sps:$4 sm:$0xff]   ;;  %v4778_v1 = vld [vmem:[#allocation6 + $0x5ac] ss:$16 sps:$4 sm:$0xff]  }
  0xaa   :  { %1419 = vmatpush2.bf16.msra.mxu0 %v4689_v3  ;;  %v4776_v3 = vld [vmem:[#allocation6 + $0x5a8] ss:$16 sps:$4 sm:$0xff]  }
  0xab   :  { %1497 = vmatpush2.bf16.msra.mxu1 %v4686_v2  ;;  %1420 = vmatprep.subr.bf16.mxu0 %v4697_v5  ;;  %v4781_v2 = vld [vmem:[#allocation6 + $0x36c] ss:$16 sps:$4 sm:$0xff]  }
  0xac   :  { %1498 = vmatprep.subr.bf16.mxu1 %v4694_v4  ;;  %v4779_v4 = vld [vmem:[#allocation6 + $0x368] ss:$16 sps:$4 sm:$0xff]   ;;  %v4784_v5 = vld [vmem:[#allocation6 + $0x58c] ss:$16 sps:$4 sm:$0xff]  }
  0xae   :  { %1421 = vmatpush2.bf16.msra.mxu0 %v4695_v7  ;;  %v4782_v7 = vld [vmem:[#allocation6 + $0x588] ss:$16 sps:$4 sm:$0xff]  }
  0xaf   :  { %1499 = vmatpush2.bf16.msra.mxu1 %v4692_v6  ;;  %1422 = vmatprep.subr.bf16.mxu0 %v4703_v11  ;;  %v4787_v6 = vld [vmem:[#allocation6 + $0x34c] ss:$16 sps:$4 sm:$0xff]  }
  0xb0   :  { %1500 = vmatprep.subr.bf16.mxu1 %v4700_v10  ;;  %v4785_v10 = vld [vmem:[#allocation6 + $0x348] ss:$16 sps:$4 sm:$0xff]   ;;  %v4790_v11 = vld [vmem:[#allocation6 + $0x56c] ss:$16 sps:$4 sm:$0xff]  }
  0xb2   :  { %1423 = vmatpush2.bf16.msra.mxu0 %v4701_v13  ;;  %v4788_v13 = vld [vmem:[#allocation6 + $0x568] ss:$16 sps:$4 sm:$0xff]  }
  0xb3   :  { %1501 = vmatpush2.bf16.msra.mxu1 %v4698_v12  ;;  %1515 = vmatprep.subr.bf16.mxu0 %v4709_v17  ;;  %v4793_v12 = vld [vmem:[#allocation6 + $0x32c] ss:$16 sps:$4 sm:$0xff]  }
  0xb4   :  { %1502 = vmatprep.subr.bf16.mxu1 %v4706_v14  ;;  %v4791_v14 = vld [vmem:[#allocation6 + $0x328] ss:$16 sps:$4 sm:$0xff]   ;;  %v4799_v17 = vld [vmem:[#allocation6 + $0x30c] ss:$16 sps:$4 sm:$0xff]  }
  0xb5   :  { %1425 = vmatmul.mubr.bf16.vlgmr.msra.gmra.mxu0 %v5455_v20 }
  0xb6   :  { %1516 = vmatpush1.bf16.msra.mxu0 %v4707_v21  ;;  %1547 = vmatprep.mubr.bf16.mxu0 %v5421_v52  ;;  %v4736_v52 = vld [vmem:[#allocation6 + $0x48c] ss:$16 sps:$4 sm:$0xff]   ;;  %v4797_v21 = vld [vmem:[#allocation6 + $0x308] ss:$16 sps:$4 sm:$0xff]  }
  0xb7   :  { %1503 = vmatpush2.bf16.msra.mxu1 %v4704_v18  ;;  %1517 = vmatprep.subr.bf16.mxu0 %v4715_v23  ;;  %v4794_v18 = vld [vmem:[#allocation6 + $0x548] ss:$16 sps:$4 sm:$0xff]   ;;  %v4805_v23 = vld [vmem:[#allocation6 + $0x60c] ss:$16 sps:$4 sm:$0xff]  }
  0xb8   :  { %1504 = vmatprep.subr.bf16.mxu1 %v4712_v22  ;;  %v4802_v22 = vld [vmem:[#allocation6 + $0x52c] ss:$16 sps:$4 sm:$0xff]  }
  0xba   :  { %1518 = vmatpush1.bf16.msra.mxu0 %v4713_v25  ;;  %v4803_v25 = vld [vmem:[#allocation6 + $0x608] ss:$16 sps:$4 sm:$0xff]  }
  0xbb   :  { %1505 = vmatpush2.bf16.msra.mxu1 %v4710_v24  ;;  %1519 = vmatprep.subr.bf16.mxu0 %v4721_v27  ;;  %v4800_v24 = vld [vmem:[#allocation6 + $0x528] ss:$16 sps:$4 sm:$0xff]   ;;  %v4811_v27 = vld [vmem:[#allocation7 + $0xe4] ss:$16 sps:$4 sm:$0xff]  }
  0xbc   :  { %1556 = vmatprep.subr.bf16.mxu1 %v4718_v26  ;;  %v4808_v26 = vld [vmem:[#allocation6 + $0x50c] ss:$16 sps:$4 sm:$0xff]  }
  0xbe   :  { %1507 = vmatmul.mubr.bf16.vlgmr.msra.gmra.mxu1 %v5431_v8  ;;  %1520 = vmatpush1.bf16.msra.mxu0 %v4719_v29  ;;  %v4737_v8 = vld [vmem:[#allocation6 + $0x248] ss:$16 sps:$4 sm:$0xff]   ;;  %v4809_v29 = vld [vmem:[#allocation7 + $0xe0] ss:$16 sps:$4 sm:$0xff]  }
  0xbf   :  { %1557 = vmatpush1.bf16.msra.mxu1 %v4716_v28  ;;  %1521 = vmatprep.subr.bf16.mxu0 %v4727_v31  ;;  %v4806_v28 = vld [vmem:[#allocation6 + $0x508] ss:$16 sps:$4 sm:$0xff]   ;;  %v4812_v31 = vld [vmem:[#allocation7 + $0xc0] ss:$16 sps:$4 sm:$0xff]  }
  0xc0   :  { %1558 = vmatprep.subr.bf16.mxu1 %v4724_v30  ;;  %1588 = vmatprep.mubr.bf16.mxu1 %v5449_v36  ;;  %v4748_v36 = vld [vmem:[#allocation6 + $0x44c] ss:$16 sps:$4 sm:$0xff]   ;;  %v4814_v30 = vld [vmem:[#allocation7 + $0xc4] ss:$16 sps:$4 sm:$0xff]  }
  0xc2   :  { %1522 = vmatpush1.bf16.msra.mxu0 %v4725_v33  ;;  %v4815_v33 = vld [vmem:[#allocation7 + $0xa0] ss:$16 sps:$4 sm:$0xff]  }
  0xc3   :  { %1559 = vmatpush1.bf16.msra.mxu1 %v4722_v32  ;;  %1523 = vmatprep.subr.bf16.mxu0 %v4733_v35  ;;  %v4817_v32 = vld [vmem:[#allocation7 + $0xa4] ss:$16 sps:$4 sm:$0xff]   ;;  %v4821_v35 = vld [vmem:[#allocation7 + $0x60] ss:$16 sps:$4 sm:$0xff]  }
  0xc4   :  { %1560 = vmatprep.subr.bf16.mxu1 %v4730_v34  ;;  %v4818_v34 = vld [vmem:[#allocation7 + $0x80] ss:$16 sps:$4 sm:$0xff]  }
  0xc6   :  { %1524 = vmatpush1.bf16.msra.mxu0 %v4731_v38  ;;  %v4865_v38 = vld [vmem:[#allocation7 + $0x2e4] ss:$16 sps:$4 sm:$0xff]  }
  0xc7   :  { %1561 = vmatpush1.bf16.msra.mxu1 %v4728_v37  ;;  %1525 = vmatprep.subr.bf16.mxu0 %v4739_v39  ;;  %v4863_v37 = vld [vmem:[#allocation7 + $0x2e0] ss:$16 sps:$4 sm:$0xff]   ;;  %v4871_v39 = vld [vmem:[#allocation7 + $0x2c4] ss:$16 sps:$4 sm:$0xff]  }
  0xc8   :  { %1562 = vmatprep.subr.bf16.mxu1 %v4736_v52  ;;  %v4869_v52 = vld [vmem:[#allocation7 + $0x2c0] ss:$16 sps:$4 sm:$0xff]  }
  0xca   :  { %1526 = vmatpush1.bf16.msra.mxu0 %v4737_v8  ;;  %v4827_v8 = vld [vmem:[#allocation7 + $0x20] ss:$16 sps:$4 sm:$0xff]  }
  0xcb   :  { %1563 = vmatpush1.bf16.msra.mxu1 %v4734_v40  ;;  %1527 = vmatprep.subr.bf16.mxu0 %v4745_v42  ;;  %v4829_v40 = vld [vmem:[#allocation7 + $0x24] ss:$16 sps:$4 sm:$0xff]  }
  0xcc   :  { %1564 = vmatprep.subr.bf16.mxu1 %v4742_v41  ;;  %v4875_v41 = vld [vmem:[#allocation7 + $0x2a0] ss:$16 sps:$4 sm:$0xff]   ;;  %v4877_v42 = vld [vmem:[#allocation7 + $0x2a4] ss:$16 sps:$4 sm:$0xff]  }
  0xce   :  { %1528 = vmatpush1.bf16.msra.mxu0 %v4743_v44  ;;  %v4830_v44 = vld [vmem:[#allocation7] ss:$16 sps:$4 sm:$0xff]  }
  0xcf   :  { %1565 = vmatpush1.bf16.msra.mxu1 %v4740_v43  ;;  %1529 = vmatprep.subr.bf16.mxu0 %v4751_v45  ;;  %v4832_v43 = vld [vmem:[#allocation7 + $0x4] ss:$16 sps:$4 sm:$0xff]  }
  0xd0   :  { %1566 = vmatprep.subr.bf16.mxu1 %v4748_v36  ;;  %v4881_v36 = vld [vmem:[#allocation7 + $0x280] ss:$16 sps:$4 sm:$0xff]   ;;  %v4883_v45 = vld [vmem:[#allocation7 + $0x284] ss:$16 sps:$4 sm:$0xff]  }
  0xd2   :  { %1530 = vmatpush1.bf16.msra.mxu0 %v4749_v47  ;;  %v4833_v47 = vld [vmem:[#allocation7 + $0x1e0] ss:$16 sps:$4 sm:$0xff]  }
  0xd3   :  { %1567 = vmatpush1.bf16.msra.mxu1 %v4746_v46  ;;  %1531 = vmatprep.subr.bf16.mxu0 %v4757_v49  ;;  %v4835_v46 = vld [vmem:[#allocation7 + $0x1e4] ss:$16 sps:$4 sm:$0xff]  }
  0xd4   :  { %1568 = vmatprep.subr.bf16.mxu1 %v4754_v48  ;;  %v4887_v48 = vld [vmem:[#allocation7 + $0x260] ss:$16 sps:$4 sm:$0xff]   ;;  %v4889_v49 = vld [vmem:[#allocation7 + $0x264] ss:$16 sps:$4 sm:$0xff]  }
  0xd6   :  { %1532 = vmatpush2.bf16.msra.mxu0 %v4755_v51  ;;  %v4836_v51 = vld [vmem:[#allocation7 + $0x1c0] ss:$16 sps:$4 sm:$0xff]  }
  0xd7   :  { %1569 = vmatpush1.bf16.msra.mxu1 %v4752_v50  ;;  %1533 = vmatprep.subr.bf16.mxu0 %v4763_v54  ;;  %v4838_v50 = vld [vmem:[#allocation7 + $0x1c4] ss:$16 sps:$4 sm:$0xff]  }
  0xd8   :  { %1570 = vmatprep.subr.bf16.mxu1 %v4760_v53  ;;  %v4893_v53 = vld [vmem:[#allocation7 + $0x240] ss:$16 sps:$4 sm:$0xff]   ;;  %v4895_v54 = vld [vmem:[#allocation7 + $0x244] ss:$16 sps:$4 sm:$0xff]  }
  0xda   :  { %1534 = vmatpush2.bf16.msra.mxu0 %v4761_v56  ;;  %v4839_v56 = vld [vmem:[#allocation7 + $0x1a0] ss:$16 sps:$4 sm:$0xff]  }
  0xdb   :  { %1571 = vmatpush1.bf16.msra.mxu1 %v4758_v55  ;;  %1535 = vmatprep.subr.bf16.mxu0 %v4769_v58  ;;  %v4841_v55 = vld [vmem:[#allocation7 + $0x1a4] ss:$16 sps:$4 sm:$0xff]  }
  0xdc   :  { %1572 = vmatprep.subr.bf16.mxu1 %v4766_v57  ;;  %v4899_v57 = vld [vmem:[#allocation7 + $0x220] ss:$16 sps:$4 sm:$0xff]   ;;  %v4901_v58 = vld [vmem:[#allocation7 + $0x224] ss:$16 sps:$4 sm:$0xff]  }
  0xde   :  { %1536 = vmatpush2.bf16.msra.mxu0 %v4767_v60  ;;  %v4842_v60 = vld [vmem:[#allocation7 + $0x180] ss:$16 sps:$4 sm:$0xff]  }
  0xdf   :  { %1573 = vmatpush2.bf16.msra.mxu1 %v4764_v59  ;;  %1537 = vmatprep.subr.bf16.mxu0 %v4775_v62  ;;  %v4844_v59 = vld [vmem:[#allocation7 + $0x184] ss:$16 sps:$4 sm:$0xff]  }
  0xe0   :  { %1574 = vmatprep.subr.bf16.mxu1 %v4772_v61  ;;  %v4905_v61 = vld [vmem:[#allocation7 + $0x200] ss:$16 sps:$4 sm:$0xff]   ;;  %v4907_v62 = vld [vmem:[#allocation7 + $0x204] ss:$16 sps:$4 sm:$0xff]  }
  0xe2   :  { %1538 = vmatpush2.bf16.msra.mxu0 %v4773_v0  ;;  %v4845_v0 = vld [vmem:[#allocation7 + $0x160] ss:$16 sps:$4 sm:$0xff]  }
  0xe3   :  { %1575 = vmatpush2.bf16.msra.mxu1 %v4770_v63  ;;  %1539 = vmatprep.subr.bf16.mxu0 %v4781_v2  ;;  %v4847_v63 = vld [vmem:[#allocation7 + $0x164] ss:$16 sps:$4 sm:$0xff]  }
  0xe4   :  { %1576 = vmatprep.subr.bf16.mxu1 %v4778_v1  ;;  %v4911_v1 = vld [vmem:[#allocation7 + $0x3e0] ss:$16 sps:$4 sm:$0xff]   ;;  %v4913_v2 = vld [vmem:[#allocation7 + $0x3e4] ss:$16 sps:$4 sm:$0xff]  }
  0xe6   :  { %1540 = vmatpush2.bf16.msra.mxu0 %v4779_v4  ;;  %v4848_v4 = vld [vmem:[#allocation7 + $0x140] ss:$16 sps:$4 sm:$0xff]  }
  0xe7   :  { %1577 = vmatpush2.bf16.msra.mxu1 %v4776_v3  ;;  %1541 = vmatprep.subr.bf16.mxu0 %v4787_v6  ;;  %v4850_v3 = vld [vmem:[#allocation7 + $0x144] ss:$16 sps:$4 sm:$0xff]  }
  0xe8   :  { %1578 = vmatprep.subr.bf16.mxu1 %v4784_v5  ;;  %v4917_v5 = vld [vmem:[#allocation7 + $0x3c0] ss:$16 sps:$4 sm:$0xff]   ;;  %v4919_v6 = vld [vmem:[#allocation7 + $0x3c4] ss:$16 sps:$4 sm:$0xff]  }
  0xea   :  { %1542 = vmatpush2.bf16.msra.mxu0 %v4785_v10  ;;  %v4851_v10 = vld [vmem:[#allocation7 + $0x120] ss:$16 sps:$4 sm:$0xff]  }
  0xeb   :  { %1579 = vmatpush2.bf16.msra.mxu1 %v4782_v7  ;;  %1543 = vmatprep.subr.bf16.mxu0 %v4793_v12  ;;  %v4853_v7 = vld [vmem:[#allocation7 + $0x124] ss:$16 sps:$4 sm:$0xff]  }
  0xec   :  { %1580 = vmatprep.subr.bf16.mxu1 %v4790_v11  ;;  %v4923_v11 = vld [vmem:[#allocation7 + $0x3a0] ss:$16 sps:$4 sm:$0xff]   ;;  %v4925_v12 = vld [vmem:[#allocation7 + $0x3a4] ss:$16 sps:$4 sm:$0xff]  }
  0xee   :  { %1544 = vmatpush2.bf16.msra.mxu0 %v4791_v14  ;;  %v4854_v14 = vld [vmem:[#allocation7 + $0x100] ss:$16 sps:$4 sm:$0xff]  }
  0xef   :  { %1581 = vmatpush2.bf16.msra.mxu1 %v4788_v13  ;;  %1545 = vmatprep.subr.bf16.mxu0 %v4799_v17  ;;  %v4856_v13 = vld [vmem:[#allocation7 + $0x104] ss:$16 sps:$4 sm:$0xff]  }
  0xf0   :  { %1582 = vmatprep.subr.bf16.mxu1 %v4796_v15 }
  0xf2   :  { %1546 = vmatpush2.bf16.msra.mxu0 %v4797_v21 }
  0xf3   :  { %1583 = vmatpush2.bf16.msra.mxu1 %v4794_v18  ;;  %1611 = vmatprep.subr.bf16.mxu0 %v4805_v23  ;;  %v4931_v18 = vld [vmem:[#allocation7 + $0x384] ss:$16 sps:$4 sm:$0xff]   ;;  %v4859_v23 = vld [vmem:[#allocation7 + $0xec] ss:$16 sps:$4 sm:$0xff]  }
  0xf4   :  { %1584 = vmatprep.subr.bf16.mxu1 %v4802_v22 }
  0xf5   :  { %1548 = vmatmul.mubr.bf16.vlgmr.msra.gmra.mxu0 %v5433_v9  ;;  %v4820_v9 = vld [vmem:[#allocation7 + $0x84] ss:$16 sps:$4 sm:$0xff]  }
  0xf6   :  { %1612 = vmatpush1.bf16.msra.mxu0 %v4803_v25  ;;  %1629 = vmatprep.mubr.bf16.mxu0 %v5335_v16  ;;  %v4823_v16 = vld [vmem:[#allocation7 + $0x64] ss:$16 sps:$4 sm:$0xff]  }
  0xf7   :  { %1585 = vmatpush2.bf16.msra.mxu1 %v4800_v24  ;;  %2447 = vmatprep.subr.bf16.mxu0 %v4811_v27  ;;  %v4929_v24 = vld [vmem:[#allocation7 + $0x380] ss:$16 sps:$4 sm:$0xff]   ;;  %v4937_v27 = vld [vmem:[#allocation7 + $0x364] ss:$16 sps:$4 sm:$0xff]  }
  0xf8   :  { %1586 = vmatprep.subr.bf16.mxu1 %v4808_v26 }
  0xfb   :  { %1587 = vmatpush2.bf16.msra.mxu1 %v4806_v28 }
  0xfc   :  { %2488 = vmatprep.subr.bf16.mxu1 %v4865_v38  ;;  %v4952_v38 = vld [vmem:[#allocation7 + $0x304] ss:$16 sps:$4 sm:$0xff]  }
  0xfd   :  { %4173 = vmatmul.mubr.msk.bf16.vlgmr.msra.gmra.mxu0 %vm1306_vm0, %v5441_v19  ;;  %v4824_v19 = vld [vmem:[#allocation7 + $0x40] ss:$16 sps:$4 sm:$0xff]  }
  0xfe   :  { %1589 = vmatmul.mubr.bf16.vlgmr.msra.gmra.mxu1 %v5455_v20  ;;  %2448 = vmatpush1.bf16.msra.mxu0 %v4809_v29  ;;  %v4826_v20 = vld [vmem:[#allocation7 + $0x44] ss:$16 sps:$4 sm:$0xff]  }
  0xff   :  { %2449 = vmatprep.subr.bf16.mxu0 %v4814_v30  ;;  %2489 = vmatpush1.bf16.msra.mxu1 %v4863_v37  ;;  %v4935_v30 = vld [vmem:[#allocation7 + $0x360] ss:$16 sps:$4 sm:$0xff]  }
 0x100   :  { %2490 = vmatprep.subr.bf16.mxu1 %v4871_v39  ;;  %v4947_v37 = vld [vmem:[#allocation7 + $0x320] ss:$16 sps:$4 sm:$0xff]  }
 0x102   :  { %2450 = vmatpush1.bf16.msra.mxu0 %v4812_v31 }
 0x103   :  { %2451 = vmatprep.subr.bf16.mxu0 %v4817_v32  ;;  %2491 = vmatpush1.bf16.msra.mxu1 %v4869_v52  ;;  %v4943_v32 = vld [vmem:[#allocation7 + $0x344] ss:$16 sps:$4 sm:$0xff]   ;;  %v306_v52 = vlaneseq }
 0x104   :  { %2492 = vmatprep.subr.bf16.mxu1 %v4877_v42 }
 0x105   :  { %v5466_v39 = vshrl.u32 %v306_v52, 7 }
 0x106   :  { %2452 = vmatpush1.bf16.msra.mxu0 %v4815_v33 }
 0x107   :  { %2453 = vmatprep.subr.bf16.mxu0 %v4820_v9  ;;  %2493 = vmatpush1.bf16.msra.mxu1 %v4875_v41  ;;  %v4941_v9 = vld [vmem:[#allocation7 + $0x340] ss:$16 sps:$4 sm:$0xff]   ;;  %v5477_v41 = vsub.s32 1, %v5466_v39 }
 0x108   :  { %2494 = vmatprep.subr.bf16.mxu1 %v4883_v45 }
 0x10a   :  { %2454 = vmatpush1.bf16.msra.mxu0 %v4818_v34 }
 0x10b   :  { %2455 = vmatprep.subr.bf16.mxu0 %v4823_v16  ;;  %2495 = vmatpush1.bf16.msra.mxu1 %v4881_v36  ;;  %v4949_v16 = vld [vmem:[#allocation7 + $0x324] ss:$16 sps:$4 sm:$0xff]  }
 0x10c   :  { %2496 = vmatprep.subr.bf16.mxu1 %v4889_v49  ;;  %v5483_v49 = vstv %s1638_s26 }
 0x10e   :  { %2456 = vmatpush1.bf16.msra.mxu0 %v4821_v35 }
 0x10f   :  { %2457 = vmatprep.subr.bf16.mxu0 %v4826_v20  ;;  %2497 = vmatpush1.bf16.msra.mxu1 %v4887_v48  ;;  %v4950_v20 = vld [vmem:[#allocation7 + $0x300] ss:$16 sps:$4 sm:$0xff]  }
 0x110   :  { %2498 = vmatprep.subr.bf16.mxu1 %v4895_v54  ;;  %v5485_v54 = vstv %s91_s25 }
 0x112   :  { %2458 = vmatpush1.bf16.msra.mxu0 %v4824_v19  ;;  %v4955_v19 = vld [vmem:[#allocation7 + $0x2ec] ss:$16 sps:$4 sm:$0xff]  }
 0x113   :  { %2459 = vmatprep.subr.bf16.mxu0 %v4829_v40  ;;  %2499 = vmatpush1.bf16.msra.mxu1 %v4893_v53  ;;  %v5469_v40 = vsub.s32 0, %v5466_v39 }
 0x114   :  { %2500 = vmatprep.subr.bf16.mxu1 %v4901_v58 }
 0x116   :  { %2460 = vmatpush1.bf16.msra.mxu0 %v4827_v8  ;;  %v5474_v8 = vld [vmem:[%s5670_s3] sm:$0xf]  ;;  %s3974_s3 = sld [smem:[#allocation2 + $0x1]] }
 0x117   :  { %2461 = vmatprep.subr.bf16.mxu0 %v4832_v43  ;;  %2501 = vmatpush1.bf16.msra.mxu1 %v4899_v57  ;;  %v309_v42 = vrot.slane %v5474_v8, %v5469_v40  ;;  %v313_v43 = vrot.slane %v5474_v8, %v5477_v41 }
 0x118   :  { %2502 = vmatprep.subr.bf16.mxu1 %v4907_v62 }
 0x11a   :  { %2462 = vmatpush1.bf16.msra.mxu0 %v4830_v44 }
 0x11b   :  { %2463 = vmatprep.subr.bf16.mxu0 %v4835_v46  ;;  %2503 = vmatpush1.bf16.msra.mxu1 %v4905_v61 }
 0x11c   :  { %2504 = vmatprep.subr.bf16.mxu1 %v4913_v2  ;;  %s2611_s4 = ssub.f32 0.0, %s3974_s3 }
 0x11e   :  { %2464 = vmatpush2.bf16.msra.mxu0 %v4833_v47 }
 0x11f   :  { %2465 = vmatprep.subr.bf16.mxu0 %v4838_v50  ;;  %2505 = vmatpush2.bf16.msra.mxu1 %v4911_v1 }
 0x120   :  { %2506 = vmatprep.subr.bf16.mxu1 %v4919_v6 }
 0x122   :  { %2466 = vmatpush2.bf16.msra.mxu0 %v4836_v51 }
 0x123   :  { %2467 = vmatprep.subr.bf16.mxu0 %v4841_v55  ;;  %2507 = vmatpush2.bf16.msra.mxu1 %v4917_v5 }
 0x124   :  { %2508 = vmatprep.subr.bf16.mxu1 %v4925_v12  ;;  %v4866_v12 = vld [vmem:[#allocation7 + $0xa8] ss:$16 sps:$4 sm:$0xff]  }
 0x126   :  { %2468 = vmatpush2.bf16.msra.mxu0 %v4839_v56 }
 0x127   :  { %2469 = vmatprep.subr.bf16.mxu0 %v4844_v59  ;;  %2509 = vmatpush2.bf16.msra.mxu1 %v4923_v11  ;;  %v4868_v11 = vld [vmem:[#allocation7 + $0xac] ss:$16 sps:$4 sm:$0xff]  }
 0x128   :  { %2510 = vmatprep.subr.bf16.mxu1 %v4931_v18  ;;  %v4886_v18 = vld [vmem:[#allocation7 + $0x4c] ss:$16 sps:$4 sm:$0xff]  }
 0x12a   :  { %2470 = vmatpush2.bf16.msra.mxu0 %v4842_v60 }
 0x12b   :  { %2471 = vmatprep.subr.bf16.mxu0 %v4847_v63  ;;  %2511 = vmatpush2.bf16.msra.mxu1 %v4929_v24  ;;  %v4898_v24 = vld [vmem:[#allocation7 + $0xc] ss:$16 sps:$4 sm:$0xff]  }
 0x12c   :  { %2512 = vmatprep.subr.bf16.mxu1 %v4937_v27  ;;  %v4902_v27 = vld [vmem:[#allocation7 + $0x1e8] ss:$16 sps:$4 sm:$0xff]  }
 0x12e   :  { %2472 = vmatpush2.bf16.msra.mxu0 %v4845_v0 }
 0x12f   :  { %2473 = vmatprep.subr.bf16.mxu0 %v4850_v3  ;;  %2513 = vmatpush2.bf16.msra.mxu1 %v4935_v30  ;;  %v4916_v30 = vld [vmem:[#allocation7 + $0x1ac] ss:$16 sps:$4 sm:$0xff]  }
 0x130   :  { %2514 = vmatprep.subr.bf16.mxu1 %v4943_v32  ;;  %v4922_v32 = vld [vmem:[#allocation7 + $0x18c] ss:$16 sps:$4 sm:$0xff]  }
 0x132   :  { %2474 = vmatpush2.bf16.msra.mxu0 %v4848_v4  ;;  %v4857_v4 = vld [vmem:[#allocation7 + $0xe8] ss:$16 sps:$4 sm:$0xff]  }
 0x133   :  { %2475 = vmatprep.subr.bf16.mxu0 %v4853_v7  ;;  %2515 = vmatpush2.bf16.msra.mxu1 %v4941_v9  ;;  %v4862_v7 = vld [vmem:[#allocation7 + $0xcc] ss:$16 sps:$4 sm:$0xff]  }
 0x134   :  { %2516 = vmatprep.subr.bf16.mxu1 %v4949_v16  ;;  %v4928_v9 = vld [vmem:[#allocation7 + $0x16c] ss:$16 sps:$4 sm:$0xff]   ;;  %v4926_v16 = vld [vmem:[#allocation7 + $0x168] ss:$16 sps:$4 sm:$0xff]  }
 0x135   :  { %v1344_v15 = vpop.f32.mrf.mxu0 }
 0x136   :  { %v1385_v17 = vpop.f32.mrf.mxu1  ;;  %2476 = vmatpush2.bf16.msra.mxu0 %v4851_v10  ;;  %v1345_v44 = vadd.f32 %v1344_v15, %v309_v42  ;;  %v4860_v10 = vld [vmem:[#allocation7 + $0xc8] ss:$16 sps:$4 sm:$0xff]   ;;  %v4880_v15 = vld [vmem:[#allocation7 + $0x6c] ss:$16 sps:$4 sm:$0xff]  }
 0x137   :  { %v1346_v21 = vpop.f32.mrf.mxu0  ;;  %2477 = vmatprep.subr.bf16.mxu0 %v4856_v13  ;;  %2517 = vmatpush2.bf16.msra.mxu1 %v4947_v37  ;;  %v4874_v13 = vld [vmem:[#allocation7 + $0x8c] ss:$16 sps:$4 sm:$0xff]   ;;  %v5502_v37 = vsub.s32 3, %v5466_v39 }
 0x138   :  { %v1387_v22 = vpop.f32.mrf.mxu1  ;;  %2518 = vmatprep.subr.bf16.mxu1 %v4952_v38  ;;  %v1347_v36 = vadd.f32 %v1346_v21, %v313_v43  ;;  %v1386_v45 = vadd.f32 %v1385_v17, %v1345_v44  ;;  %v4878_v17 = vld [vmem:[#allocation7 + $0x68] ss:$16 sps:$4 sm:$0xff]   ;;  %v4940_v42 = vld [vmem:[#allocation7 + $0x12c] ss:$16 sps:$4 sm:$0xff]  }
 0x139   :  { %v1348_v25 = vpop.f32.mrf.mxu0  ;;  %v4884_v21 = vld [vmem:[#allocation7 + $0x48] ss:$16 sps:$4 sm:$0xff]   ;;  %v321_v43 = vrot.slane %v5474_v8, %v5502_v37 }
 0x13a   :  { %v1389_v26 = vpop.f32.mrf.mxu1  ;;  %2478 = vmatpush2.bf16.msra.mxu0 %v4854_v14  ;;  %v1388_v47 = vadd.f32 %v1387_v22, %v1347_v36  ;;  %v4872_v14 = vld [vmem:[#allocation7 + $0x88] ss:$16 sps:$4 sm:$0xff]   ;;  %v4892_v22 = vld [vmem:[#allocation7 + $0x2c] ss:$16 sps:$4 sm:$0xff]  }
 0x13b   :  { %v1349_v28 = vpop.f32.mrf.mxu0  ;;  %2529 = vmatprep.subr.bf16.mxu0 %v4859_v23  ;;  %2519 = vmatpush2.bf16.msra.mxu1 %v4950_v20  ;;  %v4890_v23 = vld [vmem:[#allocation7 + $0x28] ss:$16 sps:$4 sm:$0xff]   ;;  %v4904_v26 = vld [vmem:[#allocation7 + $0x1ec] ss:$16 sps:$4 sm:$0xff]  }
 0x13c   :  { %v1390_v29 = vpop.f32.mrf.mxu1  ;;  %2570 = vmatprep.subr.bf16.mxu1 %v4955_v19  ;;  %v4896_v25 = vld [vmem:[#allocation7 + $0x8] ss:$16 sps:$4 sm:$0xff]   ;;  %v4910_v28 = vld [vmem:[#allocation7 + $0x1cc] ss:$16 sps:$4 sm:$0xff]  }
 0x13d   :  { %v4908_v29 = vld [vmem:[#allocation7 + $0x1c8] ss:$16 sps:$4 sm:$0xff]  }
 0x13e   :  { %v1467_v31 = vpop.f32.mrf.mxu1  ;;  %v4932_v19 = vld [vmem:[#allocation7 + $0x148] ss:$16 sps:$4 sm:$0xff]  }
 0x140   :  { %v1469_v33 = vpop.f32.mrf.mxu1 }
 0x142   :  { %v1471_v34 = vpop.f32.mrf.mxu1 }
 0x143   :  { %v5499_v34 = vsub.s32 2, %v5466_v39  ;;  %v4946_v39 = vld [vmem:[#allocation7 + $0x10c] ss:$16 sps:$4 sm:$0xff]  }
 0x144   :  { %v1472_v35 = vpop.f32.mrf.mxu1 }
 0x145   :  { %v4934_v35 = vld [vmem:[#allocation7 + $0x14c] ss:$16 sps:$4 sm:$0xff]   ;;  %v317_v20 = vrot.slane %v5474_v8, %v5499_v34 }
 0x175   :  { %v1426_v46 = vpop.f32.mrf.mxu0 }
 0x176   :  { %v1427_v48 = vadd.f32 %v1426_v46, %v1386_v45  ;;  %v4938_v45 = vld [vmem:[#allocation7 + $0x128] ss:$16 sps:$4 sm:$0xff]  }
 0x177   :  { %v1428_v50 = vpop.f32.mrf.mxu0 }
 0x178   :  { %v1468_v51 = vadd.f32 %v1467_v31, %v1427_v48  ;;  %v1429_v53 = vadd.f32 %v1428_v50, %v1388_v47  ;;  %v4914_v31 = vld [vmem:[#allocation7 + $0x1a8] ss:$16 sps:$4 sm:$0xff]  }
 0x179   :  { %v1430_v55 = vpop.f32.mrf.mxu0 }
 0x17a   :  { %v1640_v56 = vmax.f32 %v5483_v49, %v1468_v51  ;;  %v1470_v57 = vadd.f32 %v1469_v33, %v1429_v53  ;;  %v4920_v33 = vld [vmem:[#allocation7 + $0x188] ss:$16 sps:$4 sm:$0xff]  }
 0x17b   :  { %v1431_v58 = vpop.f32.mrf.mxu0 }
 0x17c   :  { %v1645_v59 = vmin.f32 %v5485_v54, %v1640_v56  ;;  %v1641_v60 = vmax.f32 %v5483_v49, %v1470_v57  ;;  %v4944_v56 = vld [vmem:[#allocation7 + $0x108] ss:$16 sps:$4 sm:$0xff]  }
 0x17e   :  { %v5490_v61 = vpop.f32.mrf.mxu1  ;;  %v1646_v62 = vmin.f32 %v5485_v54, %v1641_v60  ;;  %v1649_v63 = vsub.f32 %v1468_v51, %v1645_v59 }
 0x17f   :  { %v1509_v36 = vadd.f32 %v5490_v61, %v317_v20  ;;  %v4976_v20 = vld [vmem:[#allocation7 + $0x20c] ss:$16 sps:$4 sm:$0xff]  }
 0x180   :  { %v5493_v0 = vpop.f32.mrf.mxu1  ;;  %v1650_v1 = vsub.f32 %v1470_v57, %v1646_v62  ;;  %v5495_v5 = vpack.c.bf16 %v1649_v63, %v1649_v63 }
 0x181   :  { %v1511_v47 = vadd.f32 %v5493_v0, %v321_v43  ;;  %v4979_v43 = vld [vmem:[#allocation7 + $0x3ec] ss:$16 sps:$4 sm:$0xff]  }
 0x182   :  { %v1512_v2 = vpop.f32.mrf.mxu1  ;;  %v1654_v3 = vpack.c.bf16 %v1650_v1, %v1650_v1 }
 0x184   :  { %v1513_v6 = vpop.f32.mrf.mxu1  ;;  %2479 = vmatprep.mubr.bf16.mxu0 %v1654_v3 }
 0x185   :  { %2480 = vmatmul.mubr.bf16.vlgmr.msra.gmra.mxu0 %v5495_v5 }
 0x186   :  { %2530 = vmatpush1.bf16.msra.mxu0 %v4857_v4  ;;  %2561 = vmatprep.mubr.bf16.mxu0 %v1654_v3 }
 0x187   :  { %2531 = vmatprep.subr.bf16.mxu0 %v4862_v7 }
 0x18a   :  { %2532 = vmatpush1.bf16.msra.mxu0 %v4860_v10 }
 0x18b   :  { %2533 = vmatprep.subr.bf16.mxu0 %v4868_v11  ;;  %v4953_v11 = vld [vmem:[#allocation7 + $0x2e8] ss:$16 sps:$4 sm:$0xff]  }
 0x18e   :  { %2534 = vmatpush1.bf16.msra.mxu0 %v4866_v12 }
 0x18f   :  { %2535 = vmatprep.subr.bf16.mxu0 %v4874_v13  ;;  %v4958_v13 = vld [vmem:[#allocation7 + $0x2cc] ss:$16 sps:$4 sm:$0xff]  }
 0x192   :  { %2536 = vmatpush1.bf16.msra.mxu0 %v4872_v14  ;;  %v5001_v14 = vld [vmem:[#allocation9 + $0xe0] ss:$16 sps:$4 sm:$0xff]  }
 0x193   :  { %2537 = vmatprep.subr.bf16.mxu0 %v4880_v15  ;;  %v5003_v15 = vld [vmem:[#allocation9 + $0xe4] ss:$16 sps:$4 sm:$0xff]  }
 0x196   :  { %2538 = vmatpush1.bf16.msra.mxu0 %v4878_v17  ;;  %v5006_v17 = vld [vmem:[#allocation9 + $0xc4] ss:$16 sps:$4 sm:$0xff]  }
 0x197   :  { %2539 = vmatprep.subr.bf16.mxu0 %v4886_v18  ;;  %v5009_v18 = vld [vmem:[#allocation9 + $0xa4] ss:$16 sps:$4 sm:$0xff]  }
 0x19a   :  { %2540 = vmatpush1.bf16.msra.mxu0 %v4884_v21  ;;  %v4959_v21 = vld [vmem:[#allocation7 + $0x2a8] ss:$16 sps:$4 sm:$0xff]  }
 0x19b   :  { %2541 = vmatprep.subr.bf16.mxu0 %v4892_v22  ;;  %v4964_v22 = vld [vmem:[#allocation7 + $0x28c] ss:$16 sps:$4 sm:$0xff]  }
 0x19e   :  { %2542 = vmatpush1.bf16.msra.mxu0 %v4890_v23  ;;  %v5007_v23 = vld [vmem:[#allocation9 + $0xa0] ss:$16 sps:$4 sm:$0xff]  }
 0x19f   :  { %2543 = vmatprep.subr.bf16.mxu0 %v4898_v24  ;;  %v5012_v24 = vld [vmem:[#allocation9 + $0x84] ss:$16 sps:$4 sm:$0xff]  }
 0x1a2   :  { %2544 = vmatpush1.bf16.msra.mxu0 %v4896_v25  ;;  %v4962_v25 = vld [vmem:[#allocation7 + $0x288] ss:$16 sps:$4 sm:$0xff]  }
 0x1a3   :  { %2545 = vmatprep.subr.bf16.mxu0 %v4904_v26  ;;  %v4967_v26 = vld [vmem:[#allocation7 + $0x26c] ss:$16 sps:$4 sm:$0xff]  }
 0x1a6   :  { %2546 = vmatpush2.bf16.msra.mxu0 %v4902_v27  ;;  %v5010_v27 = vld [vmem:[#allocation9 + $0x80] ss:$16 sps:$4 sm:$0xff]  }
 0x1a7   :  { %2547 = vmatprep.subr.bf16.mxu0 %v4910_v28  ;;  %v5015_v28 = vld [vmem:[#allocation9 + $0x64] ss:$16 sps:$4 sm:$0xff]  }
 0x1aa   :  { %2548 = vmatpush2.bf16.msra.mxu0 %v4908_v29  ;;  %v4965_v29 = vld [vmem:[#allocation7 + $0x268] ss:$16 sps:$4 sm:$0xff]  }
 0x1ab   :  { %2549 = vmatprep.subr.bf16.mxu0 %v4916_v30  ;;  %v4970_v30 = vld [vmem:[#allocation7 + $0x24c] ss:$16 sps:$4 sm:$0xff]  }
 0x1ae   :  { %2550 = vmatpush2.bf16.msra.mxu0 %v4914_v31  ;;  %v5013_v31 = vld [vmem:[#allocation9 + $0x60] ss:$16 sps:$4 sm:$0xff]  }
 0x1af   :  { %2551 = vmatprep.subr.bf16.mxu0 %v4922_v32  ;;  %v5018_v32 = vld [vmem:[#allocation9 + $0x44] ss:$16 sps:$4 sm:$0xff]  }
 0x1b2   :  { %2552 = vmatpush2.bf16.msra.mxu0 %v4920_v33  ;;  %v4968_v33 = vld [vmem:[#allocation7 + $0x248] ss:$16 sps:$4 sm:$0xff]  }
 0x1b3   :  { %2553 = vmatprep.subr.bf16.mxu0 %v4928_v9  ;;  %v4973_v9 = vld [vmem:[#allocation7 + $0x22c] ss:$16 sps:$4 sm:$0xff]  }
 0x1b5   :  { %v1549_v38 = vpop.f32.mrf.mxu0 }
 0x1b6   :  { %2554 = vmatpush2.bf16.msra.mxu0 %v4926_v16  ;;  %v1550_v48 = vadd.f32 %v1549_v38, %v1509_v36  ;;  %v5016_v16 = vld [vmem:[#allocation9 + $0x40] ss:$16 sps:$4 sm:$0xff]   ;;  %v4971_v38 = vld [vmem:[#allocation7 + $0x228] ss:$16 sps:$4 sm:$0xff]   ;;  %v5027_v36 = vld [vmem:[#allocation9 + $0x1e4] ss:$16 sps:$4 sm:$0xff]  }
 0x1b7   :  { %v1551_v52 = vpop.f32.mrf.mxu0  ;;  %2555 = vmatprep.subr.bf16.mxu0 %v4934_v35  ;;  %v5021_v35 = vld [vmem:[#allocation9 + $0x24] ss:$16 sps:$4 sm:$0xff]  }
 0x1b8   :  { %v1552_v53 = vadd.f32 %v1551_v52, %v1511_v47  ;;  %v5024_v52 = vld [vmem:[#allocation9 + $0x4] ss:$16 sps:$4 sm:$0xff]  }
 0x1b9   :  { %v1553_v44 = vpop.f32.mrf.mxu0  ;;  %v5030_v47 = vld [vmem:[#allocation9 + $0x1c4] ss:$16 sps:$4 sm:$0xff]  }
 0x1ba   :  { %2556 = vmatpush2.bf16.msra.mxu0 %v4932_v19  ;;  %v5019_v19 = vld [vmem:[#allocation9 + $0x20] ss:$16 sps:$4 sm:$0xff]  }
 0x1bb   :  { %v1554_v46 = vpop.f32.mrf.mxu0  ;;  %2557 = vmatprep.subr.bf16.mxu0 %v4940_v42  ;;  %v4974_v42 = vld [vmem:[#allocation7 + $0x208] ss:$16 sps:$4 sm:$0xff]   ;;  %v5022_v44 = vld [vmem:[#allocation9] ss:$16 sps:$4 sm:$0xff]  }
 0x1bc   :  { %v4982_v46 = vld [vmem:[#allocation7 + $0x3cc] ss:$16 sps:$4 sm:$0xff]  }
 0x1bd   :  { %v1631_v51 = vpop.f32.mrf.mxu0 }
 0x1be   :  { %v1590_v50 = vpop.f32.mrf.mxu1  ;;  %2558 = vmatpush2.bf16.msra.mxu0 %v4938_v45  ;;  %v4977_v45 = vld [vmem:[#allocation7 + $0x3e8] ss:$16 sps:$4 sm:$0xff]  }
 0x1bf   :  { %v1591_v55 = vadd.f32 %v1590_v50, %v1550_v48  ;;  %v1633_v58 = vpop.f32.mrf.mxu0  ;;  %2559 = vmatprep.subr.bf16.mxu0 %v4946_v39  ;;  %v5025_v39 = vld [vmem:[#allocation9 + $0x1e0] ss:$16 sps:$4 sm:$0xff]   ;;  %v4980_v48 = vld [vmem:[#allocation7 + $0x3c8] ss:$16 sps:$4 sm:$0xff]   ;;  %v4985_v50 = vld [vmem:[#allocation7 + $0x3ac] ss:$16 sps:$4 sm:$0xff]  }
 0x1c0   :  { %v1592_v57 = vpop.f32.mrf.mxu1 }
 0x1c1   :  { %v1632_v8 = vadd.f32 %v1631_v51, %v1591_v55  ;;  %v1593_v59 = vadd.f32 %v1592_v57, %v1552_v53  ;;  %v1635_v61 = vpop.f32.mrf.mxu0  ;;  %v5028_v51 = vld [vmem:[#allocation9 + $0x1c0] ss:$16 sps:$4 sm:$0xff]   ;;  %v5033_v53 = vld [vmem:[#allocation9 + $0x1a4] ss:$16 sps:$4 sm:$0xff]   ;;  %v4983_v55 = vld [vmem:[#allocation7 + $0x3a8] ss:$16 sps:$4 sm:$0xff]  }
 0x1c2   :  { %v1594_v60 = vpop.f32.mrf.mxu1  ;;  %2560 = vmatpush2.bf16.msra.mxu0 %v4944_v56  ;;  %v4988_v56 = vld [vmem:[#allocation7 + $0x38c] ss:$16 sps:$4 sm:$0xff]   ;;  %v5031_v57 = vld [vmem:[#allocation9 + $0x1a0] ss:$16 sps:$4 sm:$0xff]   ;;  %v4992_v61 = vld [vmem:[#allocation7 + $0x348] ss:$16 sps:$4 sm:$0xff]  }
 0x1c3   :  { %v1642_v62 = vmax.f32 %v5483_v49, %v1632_v8  ;;  %v1634_v63 = vadd.f32 %v1633_v58, %v1593_v59  ;;  %v1636_v0 = vpop.f32.mrf.mxu0  ;;  %3420 = vmatprep.subr.bf16.mxu0 %v5003_v15  ;;  %v4986_v58 = vld [vmem:[#allocation7 + $0x388] ss:$16 sps:$4 sm:$0xff]   ;;  %v4994_v60 = vld [vmem:[#allocation7 + $0x34c] ss:$16 sps:$4 sm:$0xff]   ;;  %v5046_v15 = vld [vmem:[#allocation9 + $0x100] ss:$16 sps:$4 sm:$0xff]  }
 0x1c4   :  { %v1595_v1 = vpop.f32.mrf.mxu1  ;;  %v4989_v59 = vld [vmem:[#allocation7 + $0x368] ss:$16 sps:$4 sm:$0xff]   ;;  %v5036_v0 = vld [vmem:[#allocation9 + $0x184] ss:$16 sps:$4 sm:$0xff]  }
 0x1c5   :  { %v1647_v2 = vmin.f32 %v5485_v54, %v1642_v62  ;;  %v1643_v3 = vmax.f32 %v5483_v49, %v1634_v63  ;;  %2562 = vmatmul.mubr.bf16.vlgmr.msra.gmra.mxu0 %v5495_v5  ;;  %v4956_v49 = vld [vmem:[#allocation7 + $0x2c8] ss:$16 sps:$4 sm:$0xff]   ;;  %v4961_v5 = vld [vmem:[#allocation7 + $0x2ac] ss:$16 sps:$4 sm:$0xff]  }
 0x1c6   :  { %3421 = vmatpush1.bf16.msra.mxu0 %v5001_v14  ;;  %v4997_v62 = vld [vmem:[#allocation7 + $0x32c] ss:$16 sps:$4 sm:$0xff]   ;;  %v5048_v14 = vld [vmem:[#allocation9 + $0x104] ss:$16 sps:$4 sm:$0xff]  }
 0x1c7   :  { %v1648_v4 = vmin.f32 %v5485_v54, %v1643_v3  ;;  %v1651_v6 = vsub.f32 %v1632_v8, %v1647_v2  ;;  %v5004_v54 = vld [vmem:[#allocation9 + $0xc0] ss:$16 sps:$4 sm:$0xff]   ;;  %3422 = vmatprep.subr.bf16.mxu0 %v5006_v17  ;;  %v4991_v8 = vld [vmem:[#allocation7 + $0x36c] ss:$16 sps:$4 sm:$0xff]   ;;  %v4998_v2 = vld [vmem:[#allocation7 + $0x308] ss:$16 sps:$4 sm:$0xff]  }
 0x1c8   :  { %v5000_v1 = vld [vmem:[#allocation7 + $0x30c] ss:$16 sps:$4 sm:$0xff]   ;;  %v5034_v3 = vld [vmem:[#allocation9 + $0x180] ss:$16 sps:$4 sm:$0xff]  }
 0x1c9   :  { %v1652_v7 = vsub.f32 %v1634_v63, %v1648_v4  ;;  %v5515_v12 = vpack.c.bf16 %v1651_v6, %v1651_v6  ;;  %v4995_v63 = vld [vmem:[#allocation7 + $0x328] ss:$16 sps:$4 sm:$0xff]   ;;  %v5037_v4 = vld [vmem:[#allocation9 + $0x160] ss:$16 sps:$4 sm:$0xff]   ;;  %v5039_v6 = vld [vmem:[#allocation9 + $0x164] ss:$16 sps:$4 sm:$0xff]  }
 0x1ca   :  { %3423 = vmatpush1.bf16.msra.mxu0 %v5004_v54  ;;  %v5049_v17 = vld [vmem:[#allocation9 + $0x2e0] ss:$16 sps:$4 sm:$0xff]  }
 0x1cb   :  { %v1656_v10 = vpack.c.bf16 %v1652_v7, %v1652_v7  ;;  %3424 = vmatprep.subr.bf16.mxu0 %v5009_v18  ;;  %v5042_v7 = vld [vmem:[#allocation9 + $0x144] ss:$16 sps:$4 sm:$0xff]   ;;  %v5055_v54 = vld [vmem:[#allocation9 + $0x2c0] ss:$16 sps:$4 sm:$0xff]  }
 0x1cc   :  { %v5061_v18 = vld [vmem:[#allocation9 + $0x2a0] ss:$16 sps:$4 sm:$0xff]  }
 0x1cd   :  { %2520 = vmatprep.mubr.bf16.mxu1 %v1656_v10 }
 0x1ce   :  { %2521 = vmatmul.mubr.bf16.vlgmr.msra.gmra.mxu1 %v5515_v12  ;;  %3425 = vmatpush1.bf16.msra.mxu0 %v5007_v23  ;;  %v5069_v23 = vld [vmem:[#allocation9 + $0x284] ss:$16 sps:$4 sm:$0xff]  }
 0x1cf   :  { %2571 = vmatpush1.bf16.msra.mxu1 %v4953_v11  ;;  %2602 = vmatprep.mubr.bf16.mxu1 %v1656_v10  ;;  %v5040_v10 = vld [vmem:[#allocation9 + $0x140] ss:$16 sps:$4 sm:$0xff]   ;;  %v5045_v11 = vld [vmem:[#allocation9 + $0x124] ss:$16 sps:$4 sm:$0xff]  }
 0x1d0   :  { %2572 = vmatprep.subr.bf16.mxu1 %v4958_v13  ;;  %3426 = vmatprep.subr.bf16.mxu0 %v5012_v24  ;;  %v5043_v13 = vld [vmem:[#allocation9 + $0x120] ss:$16 sps:$4 sm:$0xff]  }
 0x1d1   :  { %v5073_v24 = vld [vmem:[#allocation9 + $0x260] ss:$16 sps:$4 sm:$0xff]  }
 0x1d2   :  { %3427 = vmatpush1.bf16.msra.mxu0 %v5010_v27  ;;  %v5081_v27 = vld [vmem:[#allocation9 + $0x244] ss:$16 sps:$4 sm:$0xff]  }
 0x1d3   :  { %2573 = vmatpush1.bf16.msra.mxu1 %v4956_v49  ;;  %3428 = vmatprep.subr.bf16.mxu0 %v5015_v28  ;;  %v5051_v49 = vld [vmem:[#allocation9 + $0x2e4] ss:$16 sps:$4 sm:$0xff]   ;;  %v5085_v28 = vld [vmem:[#allocation9 + $0x220] ss:$16 sps:$4 sm:$0xff]  }
 0x1d4   :  { %2574 = vmatprep.subr.bf16.mxu1 %v4961_v5  ;;  %v5054_v5 = vld [vmem:[#allocation9 + $0xec] ss:$16 sps:$4 sm:$0xff]  }
 0x1d6   :  { %3429 = vmatpush1.bf16.msra.mxu0 %v5013_v31  ;;  %v5093_v31 = vld [vmem:[#allocation9 + $0x204] ss:$16 sps:$4 sm:$0xff]  }
 0x1d7   :  { %2575 = vmatpush1.bf16.msra.mxu1 %v4959_v21  ;;  %3430 = vmatprep.subr.bf16.mxu0 %v5018_v32  ;;  %v5063_v21 = vld [vmem:[#allocation9 + $0x2a4] ss:$16 sps:$4 sm:$0xff]   ;;  %v5097_v32 = vld [vmem:[#allocation9 + $0x3e0] ss:$16 sps:$4 sm:$0xff]  }
 0x1d8   :  { %2576 = vmatprep.subr.bf16.mxu1 %v4964_v22  ;;  %v5067_v22 = vld [vmem:[#allocation9 + $0x280] ss:$16 sps:$4 sm:$0xff]  }
 0x1da   :  { %3431 = vmatpush1.bf16.msra.mxu0 %v5016_v16  ;;  %v5105_v16 = vld [vmem:[#allocation9 + $0x3c4] ss:$16 sps:$4 sm:$0xff]  }
 0x1db   :  { %2577 = vmatpush1.bf16.msra.mxu1 %v4962_v25  ;;  %3432 = vmatprep.subr.bf16.mxu0 %v5021_v35  ;;  %v5075_v25 = vld [vmem:[#allocation9 + $0x264] ss:$16 sps:$4 sm:$0xff]   ;;  %v5109_v35 = vld [vmem:[#allocation9 + $0x3a0] ss:$16 sps:$4 sm:$0xff]  }
 0x1dc   :  { %2578 = vmatprep.subr.bf16.mxu1 %v4967_v26  ;;  %v5079_v26 = vld [vmem:[#allocation9 + $0x240] ss:$16 sps:$4 sm:$0xff]  }
 0x1de   :  { %3433 = vmatpush1.bf16.msra.mxu0 %v5019_v19  ;;  %v5117_v19 = vld [vmem:[#allocation9 + $0x384] ss:$16 sps:$4 sm:$0xff]  }
 0x1df   :  { %2579 = vmatpush1.bf16.msra.mxu1 %v4965_v29  ;;  %3434 = vmatprep.subr.bf16.mxu0 %v5024_v52  ;;  %v5087_v29 = vld [vmem:[#allocation9 + $0x224] ss:$16 sps:$4 sm:$0xff]  }
 0x1e0   :  { %2580 = vmatprep.subr.bf16.mxu1 %v4970_v30  ;;  %v5091_v30 = vld [vmem:[#allocation9 + $0x200] ss:$16 sps:$4 sm:$0xff]  }
 0x1e2   :  { %3435 = vmatpush1.bf16.msra.mxu0 %v5022_v44  ;;  %v5123_v44 = vld [vmem:[#allocation9 + $0x364] ss:$16 sps:$4 sm:$0xff]  }
 0x1e3   :  { %2581 = vmatpush1.bf16.msra.mxu1 %v4968_v33  ;;  %3436 = vmatprep.subr.bf16.mxu0 %v5027_v36  ;;  %v5099_v33 = vld [vmem:[#allocation9 + $0x3e4] ss:$16 sps:$4 sm:$0xff]  }
 0x1e4   :  { %2582 = vmatprep.subr.bf16.mxu1 %v4973_v9  ;;  %v5103_v9 = vld [vmem:[#allocation9 + $0x3c0] ss:$16 sps:$4 sm:$0xff]  }
 0x1e6   :  { %3437 = vmatpush2.bf16.msra.mxu0 %v5025_v39  ;;  %v5127_v39 = vld [vmem:[#allocation9 + $0x340] ss:$16 sps:$4 sm:$0xff]  }
 0x1e7   :  { %2583 = vmatpush1.bf16.msra.mxu1 %v4971_v38  ;;  %3438 = vmatprep.subr.bf16.mxu0 %v5030_v47  ;;  %v5111_v38 = vld [vmem:[#allocation9 + $0x3a4] ss:$16 sps:$4 sm:$0xff]  }
 0x1e8   :  { %2584 = vmatprep.subr.bf16.mxu1 %v4976_v20  ;;  %v5115_v20 = vld [vmem:[#allocation9 + $0x380] ss:$16 sps:$4 sm:$0xff]   ;;  %v5135_v47 = vld [vmem:[#allocation9 + $0x324] ss:$16 sps:$4 sm:$0xff]  }
 0x1ea   :  { %3439 = vmatpush2.bf16.msra.mxu0 %v5028_v51  ;;  %v5139_v51 = vld [vmem:[#allocation9 + $0x300] ss:$16 sps:$4 sm:$0xff]  }
 0x1eb   :  { %2585 = vmatpush1.bf16.msra.mxu1 %v4974_v42  ;;  %3440 = vmatprep.subr.bf16.mxu0 %v5033_v53  ;;  %v5147_v53 = vld [vmem:[#allocation9 + $0x2ec] ss:$16 sps:$4 sm:$0xff]  }
 0x1ec   :  { %2586 = vmatprep.subr.bf16.mxu1 %v4979_v43  ;;  %v5121_v43 = vld [vmem:[#allocation9 + $0x360] ss:$16 sps:$4 sm:$0xff]  }
 0x1ee   :  { %3441 = vmatpush2.bf16.msra.mxu0 %v5031_v57 }
 0x1ef   :  { %2587 = vmatpush2.bf16.msra.mxu1 %v4977_v45  ;;  %3442 = vmatprep.subr.bf16.mxu0 %v5036_v0 }
 0x1f0   :  { %2588 = vmatprep.subr.bf16.mxu1 %v4982_v46  ;;  %v5129_v46 = vld [vmem:[#allocation9 + $0x344] ss:$16 sps:$4 sm:$0xff]  }
 0x1f2   :  { %3443 = vmatpush2.bf16.msra.mxu0 %v5034_v3 }
 0x1f3   :  { %2589 = vmatpush2.bf16.msra.mxu1 %v4980_v48  ;;  %3444 = vmatprep.subr.bf16.mxu0 %v5039_v6  ;;  %v5133_v48 = vld [vmem:[#allocation9 + $0x320] ss:$16 sps:$4 sm:$0xff]  }
 0x1f4   :  { %2590 = vmatprep.subr.bf16.mxu1 %v4985_v50  ;;  %v5141_v50 = vld [vmem:[#allocation9 + $0x304] ss:$16 sps:$4 sm:$0xff]  }
 0x1f6   :  { %3445 = vmatpush2.bf16.msra.mxu0 %v5037_v4 }
 0x1f7   :  { %2591 = vmatpush2.bf16.msra.mxu1 %v4983_v55  ;;  %3446 = vmatprep.subr.bf16.mxu0 %v5042_v7  ;;  %v5522_v55 = vld [vmem:[%s5672_s5] sm:$0xf] }
 0x1f8   :  { %2592 = vmatprep.subr.bf16.mxu1 %v4988_v56 }
 0x1fa   :  { %3447 = vmatpush2.bf16.msra.mxu0 %v5040_v10 }
 0x1fb   :  { %2593 = vmatpush2.bf16.msra.mxu1 %v4986_v58  ;;  %3448 = vmatprep.subr.bf16.mxu0 %v5045_v11  ;;  %v1790_v58 = vrot.slane %v5522_v55, %v5469_v40 }
 0x1fc   :  { %2594 = vmatprep.subr.bf16.mxu1 %v4991_v8 }
 0x1fe   :  { %3449 = vmatpush2.bf16.msra.mxu0 %v5043_v13 }
 0x1ff   :  { %2595 = vmatpush2.bf16.msra.mxu1 %v4989_v59  ;;  %3450 = vmatprep.subr.bf16.mxu0 %v5048_v14  ;;  %v1794_v59 = vrot.slane %v5522_v55, %v5477_v41 }
 0x200   :  { %2596 = vmatprep.subr.bf16.mxu1 %v4994_v60 }
 0x202   :  { %3451 = vmatpush2.bf16.msra.mxu0 %v5046_v15 }
 0x203   :  { %2597 = vmatpush2.bf16.msra.mxu1 %v4992_v61  ;;  %3502 = vmatprep.subr.bf16.mxu0 %v5054_v5  ;;  %v5052_v5 = vld [vmem:[#allocation9 + $0xe8] ss:$16 sps:$4 sm:$0xff]  }
 0x204   :  { %2598 = vmatprep.subr.bf16.mxu1 %v4997_v62 }
 0x207   :  { %2599 = vmatpush2.bf16.msra.mxu1 %v4995_v63  ;;  %v5532_v63 = vstv %s2611_s4 }
 0x208   :  { %2600 = vmatprep.subr.bf16.mxu1 %v5000_v1 }
 0x20b   :  { %2601 = vmatpush2.bf16.msra.mxu1 %v4998_v2  ;;  %v5534_v2 = vstv %s3974_s3 }
 0x20c   :  { %3461 = vmatprep.subr.bf16.mxu1 %v5051_v49 }
 0x20e   :  { %2603 = vmatmul.mubr.bf16.vlgmr.msra.gmra.mxu1 %v5515_v12  ;;  %v5057_v12 = vld [vmem:[#allocation9 + $0x2c4] ss:$16 sps:$4 sm:$0xff]  }
 0x20f   :  { %3462 = vmatpush1.bf16.msra.mxu1 %v5049_v17 }
 0x210   :  { %3463 = vmatprep.subr.bf16.mxu1 %v5057_v12  ;;  %v5060_v12 = vld [vmem:[#allocation9 + $0xcc] ss:$16 sps:$4 sm:$0xff]  }
 0x213   :  { %3464 = vmatpush1.bf16.msra.mxu1 %v5055_v54 }
 0x214   :  { %3465 = vmatprep.subr.bf16.mxu1 %v5063_v21  ;;  %v5066_v21 = vld [vmem:[#allocation9 + $0xac] ss:$16 sps:$4 sm:$0xff]  }
 0x217   :  { %3466 = vmatpush1.bf16.msra.mxu1 %v5061_v18  ;;  %v5058_v18 = vld [vmem:[#allocation9 + $0xc8] ss:$16 sps:$4 sm:$0xff]  }
 0x218   :  { %3467 = vmatprep.subr.bf16.mxu1 %v5069_v23  ;;  %v5072_v23 = vld [vmem:[#allocation9 + $0x8c] ss:$16 sps:$4 sm:$0xff]  }
 0x21b   :  { %3468 = vmatpush1.bf16.msra.mxu1 %v5067_v22  ;;  %v5064_v22 = vld [vmem:[#allocation9 + $0xa8] ss:$16 sps:$4 sm:$0xff]  }
 0x21c   :  { %3469 = vmatprep.subr.bf16.mxu1 %v5075_v25  ;;  %v5078_v25 = vld [vmem:[#allocation9 + $0x6c] ss:$16 sps:$4 sm:$0xff]  }
 0x21f   :  { %3470 = vmatpush1.bf16.msra.mxu1 %v5073_v24  ;;  %v5070_v24 = vld [vmem:[#allocation9 + $0x88] ss:$16 sps:$4 sm:$0xff]  }
 0x220   :  { %3471 = vmatprep.subr.bf16.mxu1 %v5081_v27  ;;  %v5084_v27 = vld [vmem:[#allocation9 + $0x4c] ss:$16 sps:$4 sm:$0xff]  }
 0x223   :  { %3472 = vmatpush1.bf16.msra.mxu1 %v5079_v26  ;;  %v5076_v26 = vld [vmem:[#allocation9 + $0x68] ss:$16 sps:$4 sm:$0xff]  }
 0x224   :  { %3473 = vmatprep.subr.bf16.mxu1 %v5087_v29  ;;  %v5090_v29 = vld [vmem:[#allocation9 + $0x2c] ss:$16 sps:$4 sm:$0xff]  }
 0x227   :  { %3474 = vmatpush1.bf16.msra.mxu1 %v5085_v28  ;;  %v5082_v28 = vld [vmem:[#allocation9 + $0x48] ss:$16 sps:$4 sm:$0xff]  }
 0x228   :  { %3475 = vmatprep.subr.bf16.mxu1 %v5093_v31  ;;  %v5096_v31 = vld [vmem:[#allocation9 + $0xc] ss:$16 sps:$4 sm:$0xff]  }
 0x22b   :  { %3476 = vmatpush1.bf16.msra.mxu1 %v5091_v30  ;;  %v5088_v30 = vld [vmem:[#allocation9 + $0x28] ss:$16 sps:$4 sm:$0xff]  }
 0x22c   :  { %3477 = vmatprep.subr.bf16.mxu1 %v5099_v33  ;;  %v5102_v33 = vld [vmem:[#allocation9 + $0x1ec] ss:$16 sps:$4 sm:$0xff]  }
 0x22f   :  { %3478 = vmatpush2.bf16.msra.mxu1 %v5097_v32  ;;  %v5094_v32 = vld [vmem:[#allocation9 + $0x8] ss:$16 sps:$4 sm:$0xff]  }
 0x230   :  { %3479 = vmatprep.subr.bf16.mxu1 %v5105_v16  ;;  %v5108_v16 = vld [vmem:[#allocation9 + $0x1cc] ss:$16 sps:$4 sm:$0xff]  }
 0x233   :  { %3480 = vmatpush2.bf16.msra.mxu1 %v5103_v9  ;;  %v5100_v9 = vld [vmem:[#allocation9 + $0x1e8] ss:$16 sps:$4 sm:$0xff]  }
 0x234   :  { %3481 = vmatprep.subr.bf16.mxu1 %v5111_v38  ;;  %v5114_v38 = vld [vmem:[#allocation9 + $0x1ac] ss:$16 sps:$4 sm:$0xff]  }
 0x237   :  { %3482 = vmatpush2.bf16.msra.mxu1 %v5109_v35  ;;  %v5106_v35 = vld [vmem:[#allocation9 + $0x1c8] ss:$16 sps:$4 sm:$0xff]  }
 0x238   :  { %3483 = vmatprep.subr.bf16.mxu1 %v5117_v19  ;;  %v5120_v19 = vld [vmem:[#allocation9 + $0x18c] ss:$16 sps:$4 sm:$0xff]  }
 0x23b   :  { %3484 = vmatpush2.bf16.msra.mxu1 %v5115_v20  ;;  %v5112_v20 = vld [vmem:[#allocation9 + $0x1a8] ss:$16 sps:$4 sm:$0xff]  }
 0x23c   :  { %3485 = vmatprep.subr.bf16.mxu1 %v5123_v44  ;;  %v5124_v44 = vld [vmem:[#allocation9 + $0x168] ss:$16 sps:$4 sm:$0xff]  }
 0x23f   :  { %3486 = vmatpush2.bf16.msra.mxu1 %v5121_v43  ;;  %v1798_v43 = vrot.slane %v5522_v55, %v5499_v34 }
 0x240   :  { %3487 = vmatprep.subr.bf16.mxu1 %v5129_v46 }
 0x243   :  { %3488 = vmatpush2.bf16.msra.mxu1 %v5127_v39  ;;  %v5130_v39 = vld [vmem:[#allocation9 + $0x148] ss:$16 sps:$4 sm:$0xff]  }
 0x244   :  { %3489 = vmatprep.subr.bf16.mxu1 %v5135_v47 }
 0x245   :  { %v2481_v52 = vpop.f32.mrf.mxu0 }
 0x246   :  { %v2482_v61 = vadd.f32 %v2481_v52, %v1790_v58  ;;  %v5118_v52 = vld [vmem:[#allocation9 + $0x188] ss:$16 sps:$4 sm:$0xff]  }
 0x247   :  { %v2483_v42 = vpop.f32.mrf.mxu0  ;;  %3490 = vmatpush2.bf16.msra.mxu1 %v5133_v48  ;;  %v5138_v48 = vld [vmem:[#allocation9 + $0x12c] ss:$16 sps:$4 sm:$0xff]  }
 0x248   :  { %3491 = vmatprep.subr.bf16.mxu1 %v5141_v50  ;;  %v2484_v1 = vadd.f32 %v2483_v42, %v1794_v59  ;;  %v5126_v42 = vld [vmem:[#allocation9 + $0x16c] ss:$16 sps:$4 sm:$0xff]   ;;  %v5136_v59 = vld [vmem:[#allocation9 + $0x128] ss:$16 sps:$4 sm:$0xff]  }
 0x249   :  { %v2485_v36 = vpop.f32.mrf.mxu0 }
 0x24a   :  { %v5132_v36 = vld [vmem:[#allocation9 + $0x14c] ss:$16 sps:$4 sm:$0xff]  }
 0x24b   :  { %v2486_v45 = vpop.f32.mrf.mxu0  ;;  %3492 = vmatpush2.bf16.msra.mxu1 %v5139_v51 }
 0x24c   :  { %3543 = vmatprep.subr.bf16.mxu1 %v5147_v53  ;;  %v1802_v45 = vrot.slane %v5522_v55, %v5502_v37 }
 0x285   :  { %v5524_v56 = vpop.f32.mrf.mxu0 }
 0x286   :  { %v2564_v46 = vadd.f32 %v5524_v56, %v1798_v43  ;;  %v5186_v43 = vld [vmem:[#allocation9 + $0x34c] ss:$16 sps:$4 sm:$0xff]  }
 0x287   :  { %v5526_v57 = vpop.f32.mrf.mxu0 }
 0x288   :  { %v2566_v50 = vadd.f32 %v5526_v57, %v1802_v45  ;;  %v5187_v45 = vld [vmem:[#allocation9 + $0x328] ss:$16 sps:$4 sm:$0xff]  }
 0x289   :  { %v2567_v8 = vpop.f32.mrf.mxu0 }
 0x28b   :  { %v2568_v60 = vpop.f32.mrf.mxu0 }
 0x28e   :  { %v2522_v62 = vpop.f32.mrf.mxu1 }
 0x28f   :  { %v2523_v0 = vadd.f32 %v2522_v62, %v2482_v61  ;;  %v5144_v61 = vld [vmem:[#allocation9 + $0x10c] ss:$16 sps:$4 sm:$0xff]  }
 0x290   :  { %v2524_v3 = vpop.f32.mrf.mxu1 }
 0x291   :  { %v2613_v4 = vmax.f32 %v5532_v63, %v2523_v0  ;;  %v2525_v6 = vadd.f32 %v2524_v3, %v2484_v1 }
 0x292   :  { %v2526_v7 = vpop.f32.mrf.mxu1 }
 0x293   :  { %v2618_v10 = vmin.f32 %v5534_v2, %v2613_v4  ;;  %v2614_v11 = vmax.f32 %v5532_v63, %v2525_v6 }
 0x294   :  { %v2527_v13 = vpop.f32.mrf.mxu1 }
 0x295   :  { %v2619_v14 = vmin.f32 %v5534_v2, %v2614_v11  ;;  %v2622_v15 = vsub.f32 %v2523_v0, %v2618_v10  ;;  %v5142_v0 = vld [vmem:[#allocation9 + $0x108] ss:$16 sps:$4 sm:$0xff]   ;;  %v5150_v10 = vld [vmem:[#allocation9 + $0x2cc] ss:$16 sps:$4 sm:$0xff]  }
 0x296   :  { %v5151_v11 = vld [vmem:[#allocation9 + $0x2a8] ss:$16 sps:$4 sm:$0xff]   ;;  %v5156_v13 = vld [vmem:[#allocation9 + $0x28c] ss:$16 sps:$4 sm:$0xff]  }
 0x297   :  { %v2623_v17 = vsub.f32 %v2525_v6, %v2619_v14  ;;  %v5540_v54 = vpack.c.bf16 %v2622_v15, %v2622_v15  ;;  %v5145_v6 = vld [vmem:[#allocation9 + $0x2e8] ss:$16 sps:$4 sm:$0xff]  }
 0x298   :  { %v5193_v14 = vld [vmem:[%s5675_s8 + $0x78] sm:$0xff]  }
 0x299   :  { %v2627_v49 = vpack.c.bf16 %v2623_v17, %v2623_v17  ;;  %v5194_v15 = vld [vmem:[%s5675_s8 + $0x38] sm:$0xff]   ;;  %v5195_v17 = vld [vmem:[%s5675_s8 + $0x70] sm:$0xff]  }
 0x29b   :  { %3452 = vmatprep.mubr.bf16.mxu0 %v2627_v49 }
 0x29c   :  { %3453 = vmatmul.mubr.bf16.vlgmr.msra.gmra.mxu0 %v5540_v54 }
 0x29d   :  { %3503 = vmatpush1.bf16.msra.mxu0 %v5052_v5  ;;  %3534 = vmatprep.mubr.bf16.mxu0 %v2627_v49  ;;  %v5154_v49 = vld [vmem:[#allocation9 + $0x288] ss:$16 sps:$4 sm:$0xff]   ;;  %v5196_v5 = vld [vmem:[%s5675_s8 + $0x30] sm:$0xff]  }
 0x29e   :  { %3504 = vmatprep.subr.bf16.mxu0 %v5060_v12  ;;  %v5197_v12 = vld [vmem:[%s5675_s8 + $0x68] sm:$0xff]  }
 0x2a1   :  { %3505 = vmatpush1.bf16.msra.mxu0 %v5058_v18  ;;  %v5157_v18 = vld [vmem:[#allocation9 + $0x268] ss:$16 sps:$4 sm:$0xff]  }
 0x2a2   :  { %3506 = vmatprep.subr.bf16.mxu0 %v5066_v21  ;;  %v5198_v21 = vld [vmem:[%s5675_s8 + $0x28] sm:$0xff]  }
 0x2a5   :  { %3507 = vmatpush1.bf16.msra.mxu0 %v5064_v22  ;;  %v5162_v22 = vld [vmem:[#allocation9 + $0x24c] ss:$16 sps:$4 sm:$0xff]  }
 0x2a6   :  { %3508 = vmatprep.subr.bf16.mxu0 %v5072_v23  ;;  %v5199_v23 = vld [vmem:[%s5675_s8 + $0x60] sm:$0xff]  }
 0x2a9   :  { %3509 = vmatpush1.bf16.msra.mxu0 %v5070_v24  ;;  %v5160_v24 = vld [vmem:[#allocation9 + $0x248] ss:$16 sps:$4 sm:$0xff]  }
 0x2aa   :  { %3510 = vmatprep.subr.bf16.mxu0 %v5078_v25  ;;  %v5200_v25 = vld [vmem:[%s5675_s8 + $0x20] sm:$0xff]  }
 0x2ad   :  { %3511 = vmatpush1.bf16.msra.mxu0 %v5076_v26  ;;  %v5165_v26 = vld [vmem:[#allocation9 + $0x22c] ss:$16 sps:$4 sm:$0xff]  }
 0x2ae   :  { %3512 = vmatprep.subr.bf16.mxu0 %v5084_v27  ;;  %v5201_v27 = vld [vmem:[%s5675_s8 + $0x58] sm:$0xff]  }
 0x2b1   :  { %3513 = vmatpush1.bf16.msra.mxu0 %v5082_v28  ;;  %v5163_v28 = vld [vmem:[#allocation9 + $0x228] ss:$16 sps:$4 sm:$0xff]  }
 0x2b2   :  { %3514 = vmatprep.subr.bf16.mxu0 %v5090_v29  ;;  %v5202_v29 = vld [vmem:[%s5675_s8 + $0x18] sm:$0xff]  }
 0x2b5   :  { %3515 = vmatpush1.bf16.msra.mxu0 %v5088_v30  ;;  %v5168_v30 = vld [vmem:[#allocation9 + $0x20c] ss:$16 sps:$4 sm:$0xff]  }
 0x2b6   :  { %3516 = vmatprep.subr.bf16.mxu0 %v5096_v31  ;;  %v5166_v31 = vld [vmem:[#allocation9 + $0x208] ss:$16 sps:$4 sm:$0xff]  }
 0x2b9   :  { %3517 = vmatpush1.bf16.msra.mxu0 %v5094_v32  ;;  %v5171_v32 = vld [vmem:[#allocation9 + $0x3ec] ss:$16 sps:$4 sm:$0xff]  }
 0x2ba   :  { %3518 = vmatprep.subr.bf16.mxu0 %v5102_v33  ;;  %v5169_v33 = vld [vmem:[#allocation9 + $0x3e8] ss:$16 sps:$4 sm:$0xff]  }
 0x2bd   :  { %3519 = vmatpush2.bf16.msra.mxu0 %v5100_v9  ;;  %v5174_v9 = vld [vmem:[#allocation9 + $0x3cc] ss:$16 sps:$4 sm:$0xff]  }
 0x2be   :  { %3520 = vmatprep.subr.bf16.mxu0 %v5108_v16  ;;  %v5172_v16 = vld [vmem:[#allocation9 + $0x3c8] ss:$16 sps:$4 sm:$0xff]  }
 0x2c1   :  { %3521 = vmatpush2.bf16.msra.mxu0 %v5106_v35  ;;  %v5177_v35 = vld [vmem:[#allocation9 + $0x3ac] ss:$16 sps:$4 sm:$0xff]  }
 0x2c2   :  { %3522 = vmatprep.subr.bf16.mxu0 %v5114_v38  ;;  %v5175_v38 = vld [vmem:[#allocation9 + $0x3a8] ss:$16 sps:$4 sm:$0xff]  }
 0x2c5   :  { %3523 = vmatpush2.bf16.msra.mxu0 %v5112_v20  ;;  %v5180_v20 = vld [vmem:[#allocation9 + $0x38c] ss:$16 sps:$4 sm:$0xff]  }
 0x2c6   :  { %3524 = vmatprep.subr.bf16.mxu0 %v5120_v19  ;;  %v5178_v19 = vld [vmem:[#allocation9 + $0x388] ss:$16 sps:$4 sm:$0xff]  }
 0x2c9   :  { %3525 = vmatpush2.bf16.msra.mxu0 %v5118_v52  ;;  %v5183_v52 = vld [vmem:[#allocation9 + $0x36c] ss:$16 sps:$4 sm:$0xff]  }
 0x2ca   :  { %3526 = vmatprep.subr.bf16.mxu0 %v5126_v42  ;;  %v5181_v42 = vld [vmem:[#allocation9 + $0x368] ss:$16 sps:$4 sm:$0xff]  }
 0x2cd   :  { %3527 = vmatpush2.bf16.msra.mxu0 %v5124_v44  ;;  %v5184_v44 = vld [vmem:[#allocation9 + $0x348] ss:$16 sps:$4 sm:$0xff]  }
 0x2ce   :  { %v2604_v47 = vpop.f32.mrf.mxu1  ;;  %3528 = vmatprep.subr.bf16.mxu0 %v5132_v36  ;;  %v5189_v36 = vld [vmem:[#allocation9 + $0x32c] ss:$16 sps:$4 sm:$0xff]  }
 0x2cf   :  { %v2605_v51 = vadd.f32 %v2604_v47, %v2564_v46  ;;  %v5192_v46 = vld [vmem:[#allocation9 + $0x30c] ss:$16 sps:$4 sm:$0xff]   ;;  %v5203_v47 = vld [vmem:[%s5675_s8 + $0x50] sm:$0xff]  }
 0x2d0   :  { %v2606_v53 = vpop.f32.mrf.mxu1 }
 0x2d1   :  { %v2615_v58 = vmax.f32 %v5532_v63, %v2605_v51  ;;  %v2607_v8 = vadd.f32 %v2606_v53, %v2566_v50  ;;  %3529 = vmatpush2.bf16.msra.mxu0 %v5130_v39  ;;  %v5190_v39 = vld [vmem:[#allocation9 + $0x308] ss:$16 sps:$4 sm:$0xff]   ;;  %v5207_v53 = vld [vmem:[%s5675_s8 + $0x40] sm:$0xff]  }
 0x2d2   :  { %v2608_v60 = vpop.f32.mrf.mxu1  ;;  %3530 = vmatprep.subr.bf16.mxu0 %v5138_v48  ;;  %v5204_v48 = vld [vmem:[%s5675_s8 + $0x10] sm:$0xff]   ;;  %v5205_v50 = vld [vmem:[%s5675_s8 + $0x48] sm:$0xff]  }
 0x2d3   :  { %v2620_v55 = vmin.f32 %v5534_v2, %v2615_v58  ;;  %v2616_v56 = vmax.f32 %v5532_v63, %v2607_v8  ;;  %v5148_v63 = vld [vmem:[#allocation9 + $0x2c8] ss:$16 sps:$4 sm:$0xff]   ;;  %v5208_v58 = vld [vmem:[%s5675_s8] sm:$0xff]   ;;  %v5211_v60 = vld [vmem:[%s5675_s8 + $0xf0] sm:$0xff]  }
 0x2d4   :  { %v2609_v62 = vpop.f32.mrf.mxu1 }
 0x2d5   :  { %v2621_v1 = vmin.f32 %v5534_v2, %v2616_v56  ;;  %3531 = vmatpush2.bf16.msra.mxu0 %v5136_v59  ;;  %v2624_v57 = vsub.f32 %v2605_v51, %v2620_v55  ;;  %v5153_v2 = vld [vmem:[#allocation9 + $0x2ac] ss:$16 sps:$4 sm:$0xff]   ;;  %v5215_v62 = vld [vmem:[%s5675_s8 + $0xe0] sm:$0xff]  }
 0x2d6   :  { %3532 = vmatprep.subr.bf16.mxu0 %v5144_v61  ;;  %v5206_v51 = vld [vmem:[%s5675_s8 + $0x8] sm:$0xff]   ;;  %v5210_v59 = vld [vmem:[%s5675_s8 + $0xb8] sm:$0xff]   ;;  %v5212_v61 = vld [vmem:[%s5675_s8 + $0xb0] sm:$0xff]  }
 0x2d7   :  { %v2625_v3 = vsub.f32 %v2607_v8, %v2621_v1  ;;  %v5553_v7 = vpack.c.bf16 %v2624_v57, %v2624_v57  ;;  %v5209_v8 = vld [vmem:[%s5675_s8 + $0xf8] sm:$0xff]   ;;  %v5213_v55 = vld [vmem:[%s5675_s8 + $0xe8] sm:$0xff]   ;;  %v5216_v1 = vld [vmem:[%s5675_s8 + $0xa0] sm:$0xff]  }
 0x2d8   :  { %v5214_v56 = vld [vmem:[%s5675_s8 + $0xa8] sm:$0xff]   ;;  %v5218_v57 = vld [vmem:[%s5675_s8 + $0x98] sm:$0xff]  }
 0x2d9   :  { %v2629_v4 = vpack.c.bf16 %v2625_v3, %v2625_v3  ;;  %3533 = vmatpush2.bf16.msra.mxu0 %v5142_v0  ;;  %v5217_v0 = vld [vmem:[%s5675_s8 + $0xd8] sm:$0xff]  }
 0x2da   :  { %4463 = vmatprep.subr.bf16.mxu0 %v5193_v14  ;;  %v5224_v14 = vld [vmem:[%s5675_s8 + $0x80] sm:$0xff]  }
 0x2db   :  { %3493 = vmatprep.mubr.bf16.mxu1 %v2629_v4 }
 0x2dc   :  { %3494 = vmatmul.mubr.bf16.vlgmr.msra.gmra.mxu1 %v5553_v7  ;;  %3535 = vmatmul.mubr.bf16.vlgmr.msra.gmra.mxu0 %v5540_v54  ;;  %v5159_v54 = vld [vmem:[#allocation9 + $0x26c] ss:$16 sps:$4 sm:$0xff]  }
 0x2dd   :  { %3544 = vmatpush1.bf16.msra.mxu1 %v5145_v6  ;;  %3575 = vmatprep.mubr.bf16.mxu1 %v2629_v4  ;;  %v5219_v4 = vld [vmem:[%s5675_s8 + $0xd0] sm:$0xff]  }
 0x2de   :  { %3545 = vmatprep.subr.bf16.mxu1 %v5150_v10  ;;  %4464 = vmatpush3.bf16.msra.mxu0 %v5194_v15  ;;  %v5220_v6 = vld [vmem:[%s5675_s8 + $0x90] sm:$0xff]   ;;  %v2758_v15 = vld [vmem:[%s5674_s7] sm:$0xf] }
 0x2df   :  { %4465 = vmatprep.subr.bf16.mxu0 %v5195_v17  ;;  %v2763_v17 = vrot.slane %v2758_v15, %v5469_v40 }
 0x2e1   :  { %3546 = vmatpush1.bf16.msra.mxu1 %v5148_v63  ;;  %v5221_v63 = vld [vmem:[%s5675_s8 + $0xc8] sm:$0xff]  }
 0x2e2   :  { %3547 = vmatprep.subr.bf16.mxu1 %v5153_v2  ;;  %4466 = vmatpush3.bf16.msra.mxu0 %v5196_v5  ;;  %v5222_v2 = vld [vmem:[%s5675_s8 + $0x88] sm:$0xff]  }
 0x2e3   :  { %4467 = vmatprep.subr.bf16.mxu0 %v5197_v12  ;;  %v3585_v12 = vstv %s3584_s19 }
 0x2e5   :  { %3548 = vmatpush1.bf16.msra.mxu1 %v5151_v11 }
 0x2e6   :  { %3549 = vmatprep.subr.bf16.mxu1 %v5156_v13  ;;  %4468 = vmatpush3.bf16.msra.mxu0 %v5198_v21  ;;  %v5223_v13 = vld [vmem:[%s5675_s8 + $0xc0] sm:$0xff]  }
 0x2e7   :  { %4469 = vmatprep.subr.bf16.mxu0 %v5199_v23  ;;  %v3590_v23 = vstv %s3975_s16 }
 0x2e9   :  { %3550 = vmatpush1.bf16.msra.mxu1 %v5154_v49  ;;  %v2767_v49 = vrot.slane %v2758_v15, %v5477_v41 }
 0x2ea   :  { %3551 = vmatprep.subr.bf16.mxu1 %v5159_v54  ;;  %4470 = vmatpush3.bf16.msra.mxu0 %v5200_v25 }
 0x2eb   :  { %4471 = vmatprep.subr.bf16.mxu0 %v5201_v27 }
 0x2ed   :  { %3552 = vmatpush1.bf16.msra.mxu1 %v5157_v18 }
 0x2ee   :  { %3553 = vmatprep.subr.bf16.mxu1 %v5162_v22  ;;  %4472 = vmatpush3.bf16.msra.mxu0 %v5202_v29 }
 0x2ef   :  { %4473 = vmatprep.subr.bf16.mxu0 %v5203_v47 }
 0x2f1   :  { %3554 = vmatpush1.bf16.msra.mxu1 %v5160_v24 }
 0x2f2   :  { %3555 = vmatprep.subr.bf16.mxu1 %v5165_v26  ;;  %4474 = vmatpush3.bf16.msra.mxu0 %v5204_v48 }
 0x2f3   :  { %4475 = vmatprep.subr.bf16.mxu0 %v5205_v50 }
 0x2f5   :  { %3556 = vmatpush1.bf16.msra.mxu1 %v5163_v28 }
 0x2f6   :  { %3557 = vmatprep.subr.bf16.mxu1 %v5168_v30  ;;  %4476 = vmatpush3.bf16.msra.mxu0 %v5206_v51 }
 0x2f7   :  { %4477 = vmatprep.subr.bf16.mxu0 %v5207_v53 }
 0x2f9   :  { %3558 = vmatpush1.bf16.msra.mxu1 %v5166_v31 }
 0x2fa   :  { %3559 = vmatprep.subr.bf16.mxu1 %v5171_v32  ;;  %4478 = vmatpush3.bf16.msra.mxu0 %v5208_v58 }
 0x2fd   :  { %3560 = vmatpush2.bf16.msra.mxu1 %v5169_v33 }
 0x2fe   :  { %3561 = vmatprep.subr.bf16.mxu1 %v5174_v9 }
 0x301   :  { %3562 = vmatpush2.bf16.msra.mxu1 %v5172_v16 }
 0x302   :  { %3563 = vmatprep.subr.bf16.mxu1 %v5177_v35 }
 0x305   :  { %3564 = vmatpush2.bf16.msra.mxu1 %v5175_v38  ;;  %v2771_v38 = vrot.slane %v2758_v15, %v5499_v34 }
 0x306   :  { %3565 = vmatprep.subr.bf16.mxu1 %v5180_v20  ;;  %v2775_v20 = vrot.slane %v2758_v15, %v5502_v37 }
 0x309   :  { %3566 = vmatpush2.bf16.msra.mxu1 %v5178_v19 }
 0x30a   :  { %3567 = vmatprep.subr.bf16.mxu1 %v5183_v52 }
 0x30d   :  { %3568 = vmatpush2.bf16.msra.mxu1 %v5181_v42 }
 0x30e   :  { %3569 = vmatprep.subr.bf16.mxu1 %v5186_v43 }
 0x311   :  { %3570 = vmatpush2.bf16.msra.mxu1 %v5184_v44 }
 0x312   :  { %3571 = vmatprep.subr.bf16.mxu1 %v5189_v36 }
 0x315   :  { %3572 = vmatpush2.bf16.msra.mxu1 %v5187_v45 }
 0x316   :  { %3573 = vmatprep.subr.bf16.mxu1 %v5192_v46 }
 0x319   :  { %3574 = vmatpush2.bf16.msra.mxu1 %v5190_v39 }
 0x31a   :  { %4485 = vmatprep.subr.bf16.mxu1 %v5209_v8 }
 0x31c   :  { %3576 = vmatmul.mubr.bf16.vlgmr.msra.gmra.mxu1 %v5553_v7 }
 0x31d   :  { %4486 = vmatpush3.bf16.msra.mxu1 %v5210_v59 }
 0x31e   :  { %4487 = vmatprep.subr.bf16.mxu1 %v5211_v60 }
 0x321   :  { %4488 = vmatpush3.bf16.msra.mxu1 %v5212_v61 }
 0x322   :  { %4489 = vmatprep.subr.bf16.mxu1 %v5213_v55  ;;  %v4430_v55 = vld [vmem:[%s5676_s9] ss:$0 sm:$0xff]  ;;  %s5301_s9 = scalar_lea.vmem %s3964_s21, 128 }
 0x323   :  { %p5302_p6 = scmp.ne.s32.totalorder %s3964_s21, %s5301_s9  ;;  %p5307_p8 = scmp.lt.s32.totalorder %s5301_s9, %s5301_s9 }
 0x325   :  { %4490 = vmatpush3.bf16.msra.mxu1 %v5214_v56  ;;  %p5308_p9 = por %p5307_p8, %p5306_p7 }
 0x326   :  { %4491 = vmatprep.subr.bf16.mxu1 %v5215_v62 }
 0x327   :  { %p5309_p10 = pnand %p5308_p9, %p5302_p6 }
 0x329   :  { %4492 = vmatpush3.bf16.msra.mxu1 %v5216_v1 }
 0x32a   :  { %4493 = vmatprep.subr.bf16.mxu1 %v5217_v0 }
 0x32d   :  { %4494 = vmatpush3.bf16.msra.mxu1 %v5218_v57 }
 0x32e   :  { %4495 = vmatprep.subr.bf16.mxu1 %v5219_v4 }
 0x331   :  { %4496 = vmatpush3.bf16.msra.mxu1 %v5220_v6 }
 0x332   :  { %4497 = vmatprep.subr.bf16.mxu1 %v5221_v63 }
 0x335   :  { %4498 = vmatpush3.bf16.msra.mxu1 %v5222_v2 }
 0x336   :  { %4499 = vmatprep.subr.bf16.mxu1 %v5223_v13 }
 0x339   :  { %4500 = vmatpush3.bf16.msra.mxu1 %v5224_v14 }
 0x35c   :  { %v3454_v3 = vpop.f32.mrf.mxu0 }
 0x35d   :  { %v3455_v5 = vadd.f32 %v3454_v3, %v2763_v17 }
 0x35e   :  { %v3456_v7 = vpop.f32.mrf.mxu0 }
 0x35f   :  { %v3457_v21 = vadd.f32 %v3456_v7, %v2767_v49 }
 0x360   :  { %v3458_v10 = vpop.f32.mrf.mxu0 }
 0x362   :  { %v3459_v11 = vpop.f32.mrf.mxu0 }
 0x39c   :  { %v3495_v54 = vpop.f32.mrf.mxu1  ;;  %v3536_v18 = vpop.f32.mrf.mxu0 }
 0x39d   :  { %v3496_v22 = vadd.f32 %v3495_v54, %v3455_v5  ;;  %v3537_v19 = vadd.f32 %v3536_v18, %v2771_v38 }
 0x39e   :  { %v3497_v24 = vpop.f32.mrf.mxu1  ;;  %v3538_v25 = vpop.f32.mrf.mxu0 }
 0x39f   :  { %v3586_v26 = vmax.f32 %v3585_v12, %v3496_v22  ;;  %v3498_v27 = vadd.f32 %v3497_v24, %v3457_v21  ;;  %v3539_v42 = vadd.f32 %v3538_v25, %v2775_v20 }
 0x3a0   :  { %v3499_v28 = vpop.f32.mrf.mxu1  ;;  %v3540_v29 = vpop.f32.mrf.mxu0 }
 0x3a1   :  { %v3591_v30 = vmin.f32 %v3590_v23, %v3586_v26  ;;  %v3587_v31 = vmax.f32 %v3585_v12, %v3498_v27 }
 0x3a2   :  { %v3500_v32 = vpop.f32.mrf.mxu1  ;;  %v3541_v40 = vpop.f32.mrf.mxu0 }
 0x3a3   :  { %v3592_v33 = vmin.f32 %v3590_v23, %v3587_v31  ;;  %v3595_v9 = vsub.f32 %v3496_v22, %v3591_v30 }
 0x3a5   :  { %v3596_v41 = vsub.f32 %v3498_v27, %v3592_v33  ;;  %v3599_v35 = vpack.c.bf16 %v3595_v9, %v3595_v9 }
 0x3a7   :  { %v3600_v16 = vpack.c.bf16 %v3596_v41, %v3596_v41 }
 0x3a9   :  { %3898 = vmatprep.mubr.bf16.mxu0 %v3600_v16 }
 0x3aa   :  { %3899 = vmatmul.mubr.bf16.vlgmr.msra.gmra.mxu0 %v3599_v35 }
 0x3dc   :  { %v3577_v52 = vpop.f32.mrf.mxu1 }
 0x3dd   :  { %v3578_v43 = vadd.f32 %v3577_v52, %v3537_v19 }
 0x3de   :  { %v3579_v44 = vpop.f32.mrf.mxu1 }
 0x3df   :  { %v3588_v36 = vmax.f32 %v3585_v12, %v3578_v43  ;;  %v3580_v45 = vadd.f32 %v3579_v44, %v3539_v42 }
 0x3e0   :  { %v3581_v46 = vpop.f32.mrf.mxu1 }
 0x3e1   :  { %v3593_v39 = vmin.f32 %v3590_v23, %v3588_v36  ;;  %v3589_v47 = vmax.f32 %v3585_v12, %v3580_v45 }
 0x3e2   :  { %v3582_v48 = vpop.f32.mrf.mxu1 }
 0x3e3   :  { %v3594_v50 = vmin.f32 %v3590_v23, %v3589_v47  ;;  %v3597_v51 = vsub.f32 %v3578_v43, %v3593_v39 }
 0x3e5   :  { %v3598_v53 = vsub.f32 %v3580_v45, %v3594_v50  ;;  %v3601_v8 = vpack.c.bf16 %v3597_v51, %v3597_v51 }
 0x3e7   :  { %v3602_v58 = vpack.c.bf16 %v3598_v53, %v3598_v53 }
 0x3e9   :  { %3938 = vmatprep.mubr.bf16.mxu1 %v3602_v58 }
 0x3ea   :  { %3939 = vmatmul.mubr.bf16.vlgmr.msra.gmra.mxu1 %v3601_v8 }
 0x46a   :  { %v4479_v34 = vpop.f32.mrf.mxu0 }
 0x46c   :  { %v4480_v37 = vpop.f32.mrf.mxu0 }
 0x46d   :  { %v4481_v61 = vadd.f32 %v4480_v37, %v4479_v34 }
 0x46e   :  { %v4482_v59 = vpop.f32.mrf.mxu0 }
 0x46f   :  { %v3901_v1 = vadd.f32 %v4481_v61, %v4430_v55 }
 0x470   :  { %v4483_v60 = vpop.f32.mrf.mxu0 }
 0x4aa   :  { %v4501_v56 = vpop.f32.mrf.mxu1 }
 0x4ac   :  { %v4502_v62 = vpop.f32.mrf.mxu1 }
 0x4ad   :  { %v4503_v0 = vadd.f32 %v4502_v62, %v4501_v56 }
 0x4ae   :  { %v4504_v57 = vpop.f32.mrf.mxu1 }
 0x4af   :  { %v3941_v3 = vadd.f32 %v4503_v0, %v3901_v1 }
 0x4b0   :  { %v4505_v4 = vpop.f32.mrf.mxu1 }
 0x4b1   :  { %3946 = vmax.xlane.f32.xlu0 %v3941_v3 }
 0x53a   :  { %v3947_v6 = vpop.xlane.xlu0 %3946 }
 0x53b   :  { %v3948_v7 = vsub.f32 %v3941_v3, %v3947_v6 }
 0x53d   :  { %v3949_v10 = vmul.f32 1.442695, %v3948_v7 }
 0x53f   :  { %5225 = vpow2.f32 %v3949_v10 }
 0x54c   :  { %v5226_v63 = vpop.eup %5225 }
 0x54d   :  { %3951 = vadd.xlane.f32.xlu0 %v5226_v63 }
 0x5d6   :  { %v3952_v2 = vpop.xlane.xlu0 %3951 }
 0x5d7   :  { %5227 = vlog2.f32 %v3952_v2 }
 0x5e4   :  { %v5228_v11 = vpop.eup %5227 }
 0x5e5   :  { %v3954_v13 = vmul.f32 0.6931472, %v5228_v11 }
 0x5e7   :  { %v3955_v14 = vsub.f32 %v3948_v7, %v3954_v13 }
 0x5e9   :  { %3956 = vst [vmem:[#allocation10] sm:$0xff] %v3955_v14 }
 0x5ea   :  { %5312 = shalt.err (!%p5309_p10)
}
 0x5eb   :  { %3966 = dma.vmem_to_hbm [thread:$0]  %s3964_s21, 128, %s5677_s10, [#allocation4]  }
 0x5ec   :  { %5327 = dma.done.wait [#allocation4], 128  }
 0x5ed   :  { %5328 = vsyncadd [#allocation4], 4294967168 }
 0x5ee   :  { %3970 = vsyncpa [#allocation3], 1 }
 0x5ef   :  { %3971 = vsyncpa [#allocation8], 1 }
 0x5f0   :  { %3972 = vsyncpa [#allocation4], 1 }
 0x5f1   :  { %3973 = vsyncpa [#allocation5], 1 }

</bundles_post_ra>
